<compile_context>
chip_gen: v5e
topology: v5e:2x2
jax: 0.10.0
libtpu: 0.0.40
codegen_flags: <defaults>
</compile_context>

<pallas_src>
import jax
import jax.numpy as jnp
from jax.experimental import pallas as pl
from jax.experimental.pallas import tpu as pltpu

# ----- model hyper-parameters (small, consistent with the module) -----------
VOCAB_SIZE   = 100
VOCAB_PAD    = 128                          # lane-padded vocab for one-hot gather
EMBED_DIM    = 128
CLASS_NUM    = 4
FILTER_SIZES = (1, 2, 3, 4, 5)
FILTER_NUM   = 128
SEQ_LEN      = 16
BATCH        = 2

MAX_FS      = max(FILTER_SIZES)
NUM_FILTERS = len(FILTER_SIZES)
CONCAT_DIM  = NUM_FILTERS * FILTER_NUM      # 640
RAGGED_COLS = FILTER_NUM * sum(NUM_FILTERS - k for k in range(MAX_FS))  # 1920
LANE_PAD    = 128                           # lane-dense padded logits width


def textcnn_kernel(ids_ref, table_ref, wconv_ref, bconv_ref, fcw_ref, fcb_ref,
                   embed_out_ref, logits_out_ref):
    """Fused embedding gather + 5 ragged tap matmuls + max-pool + bias/ReLU + FC."""
    BLpad = ids_ref.shape[0]
    B = embed_out_ref.shape[0]
    Lpad = BLpad // B
    L = Lpad - (MAX_FS - 1)
    D = table_ref.shape[1]
    F = FILTER_NUM

    # --- embedding gather via exact one-hot MXU matmul -----------------------
    # sentinel id -1 compares false everywhere -> zero row (== zero padding).
    ids = ids_ref[...]                                               # (B*Lpad, 1) i32
    vocab_iota = jax.lax.broadcasted_iota(jnp.int32, (BLpad, VOCAB_PAD), 1)
    onehot = jnp.where(ids == vocab_iota, 1.0, 0.0).astype(table_ref.dtype)
    emb = jnp.dot(onehot, table_ref[...],
                  preferred_element_type=jnp.float32)                # (B*Lpad, D) f32
    emb3 = emb.reshape(B, Lpad, D)

    # --- conv: 5 tap-aligned matmuls on the ragged (zero-free) weight --------
    # Tap k feeds filter blocks k..NUM_FILTERS-1 (ascending filter sizes).
    acc = [jnp.zeros((B * L, F), jnp.float32) for _ in range(NUM_FILTERS)]
    col = 0
    for k in range(MAX_FS):
        xk = emb3[:, k:k + L, :].reshape(B * L, D).astype(wconv_ref.dtype)
        width = (NUM_FILTERS - k) * F
        yk = jnp.dot(xk, wconv_ref[:, col:col + width],
                     preferred_element_type=jnp.float32)             # (B*L, width)
        col += width
        for i in range(k, NUM_FILTERS):                  # filter i uses tap k iff k < fs_i
            acc[i] = acc[i] + yk[:, (i - k) * F:(i - k + 1) * F]     # lane-aligned add

    # --- valid-length max-pool per block, then bias + ReLU (hoisted) ---------
    pooled = []
    for i, fs in enumerate(FILTER_SIZES):
        a3 = acc[i].reshape(B, L, F)
        p = jnp.max(a3[:, :L - fs + 1, :], axis=1)                   # (B, F) f32
        p = jnp.maximum(p + bconv_ref[:, i * F:(i + 1) * F], 0.0)
        pooled.append(p)
    pooled = jnp.concatenate(pooled, axis=-1)                        # (B, 5F) f32
    embed_out_ref[...] = pooled                                      # one lane-dense store

    # --- FC head in f32 (no extra rounding of activations) -------------------
    logits_out_ref[...] = (
        jnp.dot(pooled, fcw_ref[...], preferred_element_type=jnp.float32)
        + fcb_ref[...])


def pack_params(params):
    """Host-side one-time repack: bf16 vocab-padded table, ragged (zero-free)
    block-stacked conv weight, fused conv bias, lane-padded f32 FC params."""
    D, F = EMBED_DIM, FILTER_NUM

    table = jnp.zeros((VOCAB_PAD, D), jnp.float32)
    table = table.at[:VOCAB_SIZE].set(params['embed_table'])

    # Ragged weight: for tap k, concat the (D, F) blocks of filters with fs > k
    # (filter indices k..4, in order) -> no structural zeros stored or DMA'd.
    tap_cols = []
    for k in range(MAX_FS):
        blocks = [jnp.transpose(params[f'conv_w{i}'][:, k, :])       # (D, F)
                  for i in range(NUM_FILTERS) if FILTER_SIZES[i] > k]
        tap_cols.append(jnp.concatenate(blocks, axis=1))
    w_conv = jnp.concatenate(tap_cols, axis=1).astype(jnp.bfloat16)  # (D, 15F)
    assert w_conv.shape == (D, RAGGED_COLS)

    b_conv = jnp.concatenate([params[f'conv_b{i}'] for i in range(NUM_FILTERS)],
                             axis=1).astype(jnp.float32)             # (1, 5F)

    # FC kept in f32 (kernel does the FC matmul on f32 pooled), lane-padded.
    fc_w_pad = jnp.zeros((CONCAT_DIM, LANE_PAD), jnp.float32)
    fc_w_pad = fc_w_pad.at[:, :CLASS_NUM].set(params['fc_w'].T)
    fc_b_pad = jnp.zeros((1, LANE_PAD), jnp.float32)
    fc_b_pad = fc_b_pad.at[:, :CLASS_NUM].set(params['fc_b'])

    return {
        'table':    table.astype(jnp.bfloat16),
        'w_conv':   w_conv,
        'b_conv':   b_conv,
        'fc_w_pad': fc_w_pad,
        'fc_b_pad': fc_b_pad,
    }


def textcnn_forward(token_ids, packed):
    """token_ids: (B, L) int32.  Returns (embed_cat (B, 5F), logits (B, C))."""
    B, L = token_ids.shape
    Lpad = L + MAX_FS - 1
    # Tiny int op: time-pad ids with -1 sentinel (one-hot of -1 is all-zero
    # -> zero embedding row) and present them as a sublane column vector.
    ids_col = jnp.pad(token_ids.astype(jnp.int32), ((0, 0), (0, MAX_FS - 1)),
                      constant_values=-1).reshape(B * Lpad, 1)

    vmem = pl.BlockSpec(memory_space=pltpu.MemorySpace.VMEM)
    embed_cat, logits_pad = pl.pallas_call(
        textcnn_kernel,
        out_shape=(
            jax.ShapeDtypeStruct((B, CONCAT_DIM), jnp.float32),
            jax.ShapeDtypeStruct((B, LANE_PAD), jnp.float32),
        ),
        in_specs=[vmem] * 6,
        out_specs=(vmem, vmem),
    )(ids_col, packed['table'], packed['w_conv'], packed['b_conv'],
      packed['fc_w_pad'], packed['fc_b_pad'])
    # Consumers that accept the lane-padded (B, 128) logits should use
    # logits_pad directly; the slice is kept here only to match the module API.
    return embed_cat, logits_pad[:, :CLASS_NUM]


def init_params(key):
    """Deterministic synthetic parameters matching TextCNN.__init__ shapes."""
    keys = jax.random.split(key, 4 + 2 * NUM_FILTERS)
    params = {
        'embed_table': 0.02 * jax.random.normal(keys[0], (VOCAB_SIZE, EMBED_DIM),
                                                jnp.float32),
        'fc_w': 0.02 * jax.random.normal(keys[1], (CLASS_NUM, CONCAT_DIM),
                                         jnp.float32),
        'fc_b': 0.02 * jax.random.normal(keys[2], (1, CLASS_NUM), jnp.float32),
    }
    for i, fs in enumerate(FILTER_SIZES):
        # nn.Conv2d(1, F, (fs, D)) weight: (F, 1, fs, D) -> (F, fs, D)
        params[f'conv_w{i}'] = 0.02 * jax.random.normal(
            keys[3 + 2 * i], (FILTER_NUM, fs, EMBED_DIM), jnp.float32)
        params[f'conv_b{i}'] = 0.02 * jax.random.normal(
            keys[4 + 2 * i], (1, FILTER_NUM), jnp.float32)
    return params


def textcnn_reference(token_ids, params, matmul_dtype=jnp.float32):
    """Pure-JAX reference replicating the PyTorch forward.  matmul_dtype rounds
    only the embedding table and conv weights (exactly what the kernel rounds);
    the FC path stays f32 in both, so the tight comparison mirrors the kernel."""
    def q(x):
        return x.astype(matmul_dtype).astype(jnp.float32)

    hi = jax.lax.Precision.HIGHEST
    emb = q(params['embed_table'])[token_ids]                       # (B, L, D)
    B = token_ids.shape[0]
    pooled = []
    for i, fs in enumerate(FILTER_SIZES):
        w = q(params[f'conv_w{i}'])                                 # (F, fs, D)
        b = params[f'conv_b{i}'][0]                                 # (F,)
        l_out = SEQ_LEN - fs + 1
        acc = jnp.zeros((B, l_out, FILTER_NUM), jnp.float32)
        for k in range(fs):
            acc = acc + jnp.einsum('btd,fd->btf', emb[:, k:k + l_out, :],
                                   w[:, k, :], precision=hi)
        conv_out = jax.nn.relu(acc + b[None, None, :])
        pooled.append(jnp.max(conv_out, axis=1))                    # (B, F)
    embed_cat = jnp.concatenate(pooled, axis=1)
    logits = jnp.dot(embed_cat, params['fc_w'].T.astype(jnp.float32),
                     precision=hi) + params['fc_b'][0]
    return embed_cat, logits


if __name__ == "__main__":
    key = jax.random.PRNGKey(0)
    pkey, xkey = jax.random.split(key)
    params = init_params(pkey)
    packed = pack_params(params)
    token_ids = jax.random.randint(xkey, (BATCH, SEQ_LEN), 0, VOCAB_SIZE, jnp.int32)

    embed_cat, logits = jax.jit(textcnn_forward)(token_ids, packed)
    jax.block_until_ready((embed_cat, logits))

    assert embed_cat.shape == (BATCH, CONCAT_DIM)
    assert logits.shape == (BATCH, CLASS_NUM)

    # Tight check: reference with the same bf16 rounding of table/conv weights
    # (FC is f32 in both), so only f32 accumulation order differs.
    ref_embed, ref_logits = textcnn_reference(token_ids, params, jnp.bfloat16)
    assert jnp.allclose(embed_cat, ref_embed, atol=2e-4, rtol=2e-3)
    assert jnp.allclose(logits, ref_logits, atol=3e-4, rtol=3e-3)

    # Loose sanity check vs. the full-f32 PyTorch-equivalent forward.
    f32_embed, f32_logits = textcnn_reference(token_ids, params, jnp.float32)
    assert jnp.allclose(embed_cat, f32_embed, atol=1e-2, rtol=1e-1)
    assert jnp.allclose(logits, f32_logits, atol=1e-2, rtol=1e-1)

    print("KERNEL_OK")
</pallas_src>

<mosaic_0001>
module attributes {stable_mosaic.version = 11 : i64} {
  func.func @textcnn_kernel(%arg0: memref<40x1xi32, #tpu.memory_space<vmem>>, %arg1: memref<128x128xbf16, #tpu.memory_space<vmem>>, %arg2: memref<128x1920xbf16, #tpu.memory_space<vmem>>, %arg3: memref<1x640xf32, #tpu.memory_space<vmem>>, %arg4: memref<640x128xf32, #tpu.memory_space<vmem>>, %arg5: memref<1x128xf32, #tpu.memory_space<vmem>>, %arg6: memref<2x640xf32, #tpu.memory_space<vmem>>, %arg7: memref<2x128xf32, #tpu.memory_space<vmem>>) attributes {dimension_semantics = [], scalar_prefetch = 0 : i64, scratch_operands = 0 : i64, tpu.core_type = #tpu.core_type<tc>} {
    %c0 = arith.constant 0 : index
    %c0_0 = arith.constant 0 : index
    %0 = vector.load %arg0[%c0, %c0_0] : memref<40x1xi32, #tpu.memory_space<vmem>>, vector<40x1xi32>
    %1 = tpu.iota {dimensions = array<i32: 1>} : vector<40x128xi32>
    %2 = vector.broadcast %0 : vector<40x1xi32> to vector<40x128xi32>
    %3 = arith.cmpi eq, %2, %1 : vector<40x128xi32>
    %cst = arith.constant 1.000000e+00 : f32
    %cst_1 = arith.constant 0.000000e+00 : f32
    %4 = vector.broadcast %cst : f32 to vector<40x128xf32>
    %5 = vector.broadcast %cst_1 : f32 to vector<40x128xf32>
    %6 = arith.select %3, %4, %5 : vector<40x128xi1>, vector<40x128xf32>
    %7 = arith.truncf %6 : vector<40x128xf32> to vector<40x128xbf16>
    %c0_2 = arith.constant 0 : index
    %c0_3 = arith.constant 0 : index
    %8 = vector.load %arg1[%c0_2, %c0_3] : memref<128x128xbf16, #tpu.memory_space<vmem>>, vector<128x128xbf16>
    %cst_4 = arith.constant dense<0.000000e+00> : vector<40x128xf32>
    %9 = tpu.matmul %7, %8, %cst_4 {dimension_numbers = #tpu.dot_dimension_numbers<[1], [0], [0], [1], [0, 0, 1, 1], [], []>} : vector<40x128xbf16>, vector<128x128xbf16>, vector<40x128xf32> -> vector<40x128xf32>
    %10 = vector.shape_cast %9 : vector<40x128xf32> to vector<2x20x128xf32>
    %cst_5 = arith.constant 0.000000e+00 : f32
    %11 = vector.broadcast %cst_5 : f32 to vector<32x128xf32>
    %cst_6 = arith.constant 0.000000e+00 : f32
    %12 = vector.broadcast %cst_6 : f32 to vector<32x128xf32>
    %cst_7 = arith.constant 0.000000e+00 : f32
    %13 = vector.broadcast %cst_7 : f32 to vector<32x128xf32>
    %cst_8 = arith.constant 0.000000e+00 : f32
    %14 = vector.broadcast %cst_8 : f32 to vector<32x128xf32>
    %cst_9 = arith.constant 0.000000e+00 : f32
    %15 = vector.broadcast %cst_9 : f32 to vector<32x128xf32>
    %16 = vector.extract_strided_slice %10 {offsets = [0, 0, 0], sizes = [2, 16, 128], strides = [1, 1, 1]} : vector<2x20x128xf32> to vector<2x16x128xf32>
    %17 = vector.shape_cast %16 : vector<2x16x128xf32> to vector<32x128xf32>
    %18 = arith.truncf %17 : vector<32x128xf32> to vector<32x128xbf16>
    %c0_10 = arith.constant 0 : index
    %c0_11 = arith.constant 0 : index
    %19 = vector.load %arg2[%c0_10, %c0_11] : memref<128x1920xbf16, #tpu.memory_space<vmem>>, vector<128x640xbf16>
    %cst_12 = arith.constant dense<0.000000e+00> : vector<32x640xf32>
    %20 = tpu.matmul %18, %19, %cst_12 {dimension_numbers = #tpu.dot_dimension_numbers<[1], [0], [0], [1], [0, 0, 1, 1], [], []>} : vector<32x128xbf16>, vector<128x640xbf16>, vector<32x640xf32> -> vector<32x640xf32>
    %21 = vector.extract_strided_slice %20 {offsets = [0, 0], sizes = [32, 128], strides = [1, 1]} : vector<32x640xf32> to vector<32x128xf32>
    %22 = arith.addf %11, %21 : vector<32x128xf32>
    %23 = vector.extract_strided_slice %20 {offsets = [0, 128], sizes = [32, 128], strides = [1, 1]} : vector<32x640xf32> to vector<32x128xf32>
    %24 = arith.addf %12, %23 : vector<32x128xf32>
    %25 = vector.extract_strided_slice %20 {offsets = [0, 256], sizes = [32, 128], strides = [1, 1]} : vector<32x640xf32> to vector<32x128xf32>
    %26 = arith.addf %13, %25 : vector<32x128xf32>
    %27 = vector.extract_strided_slice %20 {offsets = [0, 384], sizes = [32, 128], strides = [1, 1]} : vector<32x640xf32> to vector<32x128xf32>
    %28 = arith.addf %14, %27 : vector<32x128xf32>
    %29 = vector.extract_strided_slice %20 {offsets = [0, 512], sizes = [32, 128], strides = [1, 1]} : vector<32x640xf32> to vector<32x128xf32>
    %30 = arith.addf %15, %29 : vector<32x128xf32>
    %31 = vector.extract_strided_slice %10 {offsets = [0, 1, 0], sizes = [2, 16, 128], strides = [1, 1, 1]} : vector<2x20x128xf32> to vector<2x16x128xf32>
    %32 = vector.shape_cast %31 : vector<2x16x128xf32> to vector<32x128xf32>
    %33 = arith.truncf %32 : vector<32x128xf32> to vector<32x128xbf16>
    %c0_13 = arith.constant 0 : index
    %c640 = arith.constant 640 : index
    %34 = vector.load %arg2[%c0_13, %c640] : memref<128x1920xbf16, #tpu.memory_space<vmem>>, vector<128x512xbf16>
    %cst_14 = arith.constant dense<0.000000e+00> : vector<32x512xf32>
    %35 = tpu.matmul %33, %34, %cst_14 {dimension_numbers = #tpu.dot_dimension_numbers<[1], [0], [0], [1], [0, 0, 1, 1], [], []>} : vector<32x128xbf16>, vector<128x512xbf16>, vector<32x512xf32> -> vector<32x512xf32>
    %36 = vector.extract_strided_slice %35 {offsets = [0, 0], sizes = [32, 128], strides = [1, 1]} : vector<32x512xf32> to vector<32x128xf32>
    %37 = arith.addf %24, %36 : vector<32x128xf32>
    %38 = vector.extract_strided_slice %35 {offsets = [0, 128], sizes = [32, 128], strides = [1, 1]} : vector<32x512xf32> to vector<32x128xf32>
    %39 = arith.addf %26, %38 : vector<32x128xf32>
    %40 = vector.extract_strided_slice %35 {offsets = [0, 256], sizes = [32, 128], strides = [1, 1]} : vector<32x512xf32> to vector<32x128xf32>
    %41 = arith.addf %28, %40 : vector<32x128xf32>
    %42 = vector.extract_strided_slice %35 {offsets = [0, 384], sizes = [32, 128], strides = [1, 1]} : vector<32x512xf32> to vector<32x128xf32>
    %43 = arith.addf %30, %42 : vector<32x128xf32>
    %44 = vector.extract_strided_slice %10 {offsets = [0, 2, 0], sizes = [2, 16, 128], strides = [1, 1, 1]} : vector<2x20x128xf32> to vector<2x16x128xf32>
    %45 = vector.shape_cast %44 : vector<2x16x128xf32> to vector<32x128xf32>
    %46 = arith.truncf %45 : vector<32x128xf32> to vector<32x128xbf16>
    %c0_15 = arith.constant 0 : index
    %c1152 = arith.constant 1152 : index
    %47 = vector.load %arg2[%c0_15, %c1152] : memref<128x1920xbf16, #tpu.memory_space<vmem>>, vector<128x384xbf16>
    %cst_16 = arith.constant dense<0.000000e+00> : vector<32x384xf32>
    %48 = tpu.matmul %46, %47, %cst_16 {dimension_numbers = #tpu.dot_dimension_numbers<[1], [0], [0], [1], [0, 0, 1, 1], [], []>} : vector<32x128xbf16>, vector<128x384xbf16>, vector<32x384xf32> -> vector<32x384xf32>
    %49 = vector.extract_strided_slice %48 {offsets = [0, 0], sizes = [32, 128], strides = [1, 1]} : vector<32x384xf32> to vector<32x128xf32>
    %50 = arith.addf %39, %49 : vector<32x128xf32>
    %51 = vector.extract_strided_slice %48 {offsets = [0, 128], sizes = [32, 128], strides = [1, 1]} : vector<32x384xf32> to vector<32x128xf32>
    %52 = arith.addf %41, %51 : vector<32x128xf32>
    %53 = vector.extract_strided_slice %48 {offsets = [0, 256], sizes = [32, 128], strides = [1, 1]} : vector<32x384xf32> to vector<32x128xf32>
    %54 = arith.addf %43, %53 : vector<32x128xf32>
    %55 = vector.extract_strided_slice %10 {offsets = [0, 3, 0], sizes = [2, 16, 128], strides = [1, 1, 1]} : vector<2x20x128xf32> to vector<2x16x128xf32>
    %56 = vector.shape_cast %55 : vector<2x16x128xf32> to vector<32x128xf32>
    %57 = arith.truncf %56 : vector<32x128xf32> to vector<32x128xbf16>
    %c0_17 = arith.constant 0 : index
    %c1536 = arith.constant 1536 : index
    %58 = vector.load %arg2[%c0_17, %c1536] : memref<128x1920xbf16, #tpu.memory_space<vmem>>, vector<128x256xbf16>
    %cst_18 = arith.constant dense<0.000000e+00> : vector<32x256xf32>
    %59 = tpu.matmul %57, %58, %cst_18 {dimension_numbers = #tpu.dot_dimension_numbers<[1], [0], [0], [1], [0, 0, 1, 1], [], []>} : vector<32x128xbf16>, vector<128x256xbf16>, vector<32x256xf32> -> vector<32x256xf32>
    %60 = vector.extract_strided_slice %59 {offsets = [0, 0], sizes = [32, 128], strides = [1, 1]} : vector<32x256xf32> to vector<32x128xf32>
    %61 = arith.addf %52, %60 : vector<32x128xf32>
    %62 = vector.extract_strided_slice %59 {offsets = [0, 128], sizes = [32, 128], strides = [1, 1]} : vector<32x256xf32> to vector<32x128xf32>
    %63 = arith.addf %54, %62 : vector<32x128xf32>
    %64 = vector.extract_strided_slice %10 {offsets = [0, 4, 0], sizes = [2, 16, 128], strides = [1, 1, 1]} : vector<2x20x128xf32> to vector<2x16x128xf32>
    %65 = vector.shape_cast %64 : vector<2x16x128xf32> to vector<32x128xf32>
    %66 = arith.truncf %65 : vector<32x128xf32> to vector<32x128xbf16>
    %c0_19 = arith.constant 0 : index
    %c1792 = arith.constant 1792 : index
    %67 = vector.load %arg2[%c0_19, %c1792] : memref<128x1920xbf16, #tpu.memory_space<vmem>>, vector<128x128xbf16>
    %cst_20 = arith.constant dense<0.000000e+00> : vector<32x128xf32>
    %68 = tpu.matmul %66, %67, %cst_20 {dimension_numbers = #tpu.dot_dimension_numbers<[1], [0], [0], [1], [0, 0, 1, 1], [], []>} : vector<32x128xbf16>, vector<128x128xbf16>, vector<32x128xf32> -> vector<32x128xf32>
    %69 = arith.addf %63, %68 : vector<32x128xf32>
    %70 = vector.shape_cast %22 : vector<32x128xf32> to vector<2x16x128xf32>
    %cst_21 = arith.constant dense<0xFF800000> : vector<2x128xf32>
    %71 = vector.multi_reduction <maximumf>, %70, %cst_21 [1] : vector<2x16x128xf32> to vector<2x128xf32>
    %c0_22 = arith.constant 0 : index
    %c0_23 = arith.constant 0 : index
    %72 = vector.load %arg3[%c0_22, %c0_23] : memref<1x640xf32, #tpu.memory_space<vmem>>, vector<1x128xf32>
    %73 = vector.broadcast %72 : vector<1x128xf32> to vector<2x128xf32>
    %74 = arith.addf %71, %73 : vector<2x128xf32>
    %cst_24 = arith.constant 0.000000e+00 : f32
    %75 = vector.broadcast %cst_24 : f32 to vector<2x128xf32>
    %76 = arith.maximumf %74, %75 : vector<2x128xf32>
    %77 = vector.shape_cast %37 : vector<32x128xf32> to vector<2x16x128xf32>
    %78 = vector.extract_strided_slice %77 {offsets = [0, 0, 0], sizes = [2, 15, 128], strides = [1, 1, 1]} : vector<2x16x128xf32> to vector<2x15x128xf32>
    %cst_25 = arith.constant dense<0xFF800000> : vector<2x128xf32>
    %79 = vector.multi_reduction <maximumf>, %78, %cst_25 [1] : vector<2x15x128xf32> to vector<2x128xf32>
    %c0_26 = arith.constant 0 : index
    %c128 = arith.constant 128 : index
    %80 = vector.load %arg3[%c0_26, %c128] : memref<1x640xf32, #tpu.memory_space<vmem>>, vector<1x128xf32>
    %81 = vector.broadcast %80 : vector<1x128xf32> to vector<2x128xf32>
    %82 = arith.addf %79, %81 : vector<2x128xf32>
    %cst_27 = arith.constant 0.000000e+00 : f32
    %83 = vector.broadcast %cst_27 : f32 to vector<2x128xf32>
    %84 = arith.maximumf %82, %83 : vector<2x128xf32>
    %85 = vector.shape_cast %50 : vector<32x128xf32> to vector<2x16x128xf32>
    %86 = vector.extract_strided_slice %85 {offsets = [0, 0, 0], sizes = [2, 14, 128], strides = [1, 1, 1]} : vector<2x16x128xf32> to vector<2x14x128xf32>
    %cst_28 = arith.constant dense<0xFF800000> : vector<2x128xf32>
    %87 = vector.multi_reduction <maximumf>, %86, %cst_28 [1] : vector<2x14x128xf32> to vector<2x128xf32>
    %c0_29 = arith.constant 0 : index
    %c256 = arith.constant 256 : index
    %88 = vector.load %arg3[%c0_29, %c256] : memref<1x640xf32, #tpu.memory_space<vmem>>, vector<1x128xf32>
    %89 = vector.broadcast %88 : vector<1x128xf32> to vector<2x128xf32>
    %90 = arith.addf %87, %89 : vector<2x128xf32>
    %cst_30 = arith.constant 0.000000e+00 : f32
    %91 = vector.broadcast %cst_30 : f32 to vector<2x128xf32>
    %92 = arith.maximumf %90, %91 : vector<2x128xf32>
    %93 = vector.shape_cast %61 : vector<32x128xf32> to vector<2x16x128xf32>
    %94 = vector.extract_strided_slice %93 {offsets = [0, 0, 0], sizes = [2, 13, 128], strides = [1, 1, 1]} : vector<2x16x128xf32> to vector<2x13x128xf32>
    %cst_31 = arith.constant dense<0xFF800000> : vector<2x128xf32>
    %95 = vector.multi_reduction <maximumf>, %94, %cst_31 [1] : vector<2x13x128xf32> to vector<2x128xf32>
    %c0_32 = arith.constant 0 : index
    %c384 = arith.constant 384 : index
    %96 = vector.load %arg3[%c0_32, %c384] : memref<1x640xf32, #tpu.memory_space<vmem>>, vector<1x128xf32>
    %97 = vector.broadcast %96 : vector<1x128xf32> to vector<2x128xf32>
    %98 = arith.addf %95, %97 : vector<2x128xf32>
    %cst_33 = arith.constant 0.000000e+00 : f32
    %99 = vector.broadcast %cst_33 : f32 to vector<2x128xf32>
    %100 = arith.maximumf %98, %99 : vector<2x128xf32>
    %101 = vector.shape_cast %69 : vector<32x128xf32> to vector<2x16x128xf32>
    %102 = vector.extract_strided_slice %101 {offsets = [0, 0, 0], sizes = [2, 12, 128], strides = [1, 1, 1]} : vector<2x16x128xf32> to vector<2x12x128xf32>
    %cst_34 = arith.constant dense<0xFF800000> : vector<2x128xf32>
    %103 = vector.multi_reduction <maximumf>, %102, %cst_34 [1] : vector<2x12x128xf32> to vector<2x128xf32>
    %c0_35 = arith.constant 0 : index
    %c512 = arith.constant 512 : index
    %104 = vector.load %arg3[%c0_35, %c512] : memref<1x640xf32, #tpu.memory_space<vmem>>, vector<1x128xf32>
    %105 = vector.broadcast %104 : vector<1x128xf32> to vector<2x128xf32>
    %106 = arith.addf %103, %105 : vector<2x128xf32>
    %cst_36 = arith.constant 0.000000e+00 : f32
    %107 = vector.broadcast %cst_36 : f32 to vector<2x128xf32>
    %108 = arith.maximumf %106, %107 : vector<2x128xf32>
    %109 = tpu.concatenate %76, %84, %92, %100, %108 in 1 : vector<2x128xf32>, vector<2x128xf32>, vector<2x128xf32>, vector<2x128xf32>, vector<2x128xf32> -> vector<2x640xf32>
    %c0_37 = arith.constant 0 : index
    %c0_38 = arith.constant 0 : index
    %110 = vector.load %arg6[%c0_37, %c0_38] : memref<2x640xf32, #tpu.memory_space<vmem>>, vector<2x640xf32>
    tpu.vector_store %arg6[%c0_37, %c0_38], %109 {strides = array<i32>} : memref<2x640xf32, #tpu.memory_space<vmem>>, vector<2x640xf32>,
    %c0_39 = arith.constant 0 : index
    %c0_40 = arith.constant 0 : index
    %111 = vector.load %arg4[%c0_39, %c0_40] : memref<640x128xf32, #tpu.memory_space<vmem>>, vector<640x128xf32>
    %cst_41 = arith.constant dense<0.000000e+00> : vector<2x128xf32>
    %112 = tpu.matmul %109, %111, %cst_41 {dimension_numbers = #tpu.dot_dimension_numbers<[1], [0], [0], [1], [0, 0, 1, 1], [], []>} : vector<2x640xf32>, vector<640x128xf32>, vector<2x128xf32> -> vector<2x128xf32>
    %c0_42 = arith.constant 0 : index
    %c0_43 = arith.constant 0 : index
    %113 = vector.load %arg5[%c0_42, %c0_43] : memref<1x128xf32, #tpu.memory_space<vmem>>, vector<1x128xf32>
    %114 = vector.broadcast %113 : vector<1x128xf32> to vector<2x128xf32>
    %115 = arith.addf %112, %114 : vector<2x128xf32>
    %c0_44 = arith.constant 0 : index
    %c0_45 = arith.constant 0 : index
    %116 = vector.load %arg7[%c0_44, %c0_45] : memref<2x128xf32, #tpu.memory_space<vmem>>, vector<2x128xf32>
    tpu.vector_store %arg7[%c0_44, %c0_45], %115 {strides = array<i32>} : memref<2x128xf32, #tpu.memory_space<vmem>>, vector<2x128xf32>,
    return
  }
}

</mosaic_0001>

<bundles_post_ra>
// kernel: textcnn_forward.1
= control target key start
LH: loop header
LB: loop body
LE: loop exit
PB: predicated region body
PF: predicated region fallthrough
CT: control target
= control target key end

     0   :  { %13 = vsyncpa [#allocation3], 0  ;;  %s3166_s0 = inlined_call_operand.vmem [shape: s32[40,1], index: 0, kind: input, shape index: {}]   ;;  %s3167_s1 = inlined_call_operand.hbm [shape: bf16[128,128], index: 1, kind: input, shape index: {}]   ;;  %s3168_s2 = inlined_call_operand.hbm [shape: bf16[128,1920], index: 2, kind: input, shape index: {}]   ;;  %s3169_s3 = inlined_call_operand.vmem [shape: f32[1,640], index: 3, kind: input, shape index: {}]   ;;  %s3170_s4 = inlined_call_operand.hbm [shape: f32[640,128], index: 4, kind: input, shape index: {}]   ;;  %s3171_s5 = inlined_call_operand.vmem [shape: f32[1,128], index: 5, kind: input, shape index: {}]   ;;  %s3172_s6 = inlined_call_operand.hbm [shape: f32[2,640], index: 6, kind: output, shape index: {0}]   ;;  %s3173_s7 = inlined_call_operand.hbm [shape: f32[2,128], index: 7, kind: output, shape index: {1}]  }
   0x1   :  { %14 = vsyncpa [#allocation6], 0 }
   0x2   :  { %15 = vsyncpa [#allocation4], 0  ;;  %s36_s26 = sshll.u32 %s3168_s2, 4  ;;  %s37_s26 = int_to_ptr.hbm [resolvable:$true] %s36_s26 }
   0x3   :  { %16 = vsyncpa [#allocation10], 0  ;;  %s2709_s27 = smov [#allocation5]   ;;  %s23_s8 = sshll.u32 %s3167_s1, 4  ;;  %s24_s8 = int_to_ptr.hbm [resolvable:$true] %s23_s8 }
   0x4   :  { %s38_s28 = sshll.u32 %s2709_s27, 4  ;;  %s2710_s9 = smov 960   ;;  %s39_s28 = int_to_ptr.vmem [resolvable:$true] %s38_s28 }
   0x5   :  { %s2711_s10 = smov 60   ;;  %s2712_s11 = smov [#allocation2]  }
   0x6   :  { %44 = dma.hbm_to_vmem [thread:$0]  %s37_s26, 15360, %s39_s28, [#allocation6], %s2710_s9, %s2710_s9, %s2711_s10  }
   0x7   :  { %s25_s12 = sshll.u32 %s2712_s11, 4  ;;  %s2713_s13 = smov 64   ;;  %s26_s12 = int_to_ptr.vmem [resolvable:$true] %s25_s12 }
   0x8   :  { %s2714_s14 = smov 4   ;;  %s51_s16 = sshll.u32 %s3170_s4, 4  ;;  %s52_s16 = int_to_ptr.hbm [resolvable:$true] %s51_s16 }
   0x9   :  { %31 = dma.hbm_to_vmem [thread:$0]  %s24_s8, 1024, %s26_s12, [#allocation3], %s2713_s13, %s2713_s13, %s2714_s14  }
   0xa   :  { %s2715_s17 = smov [#allocation7]   ;;  %s2716_s19 = smov 128  }
   0xb   :  { %s53_s18 = sshll.u32 %s2715_s17, 4  ;;  %s2717_s1 = smov 8   ;;  %s54_s18 = int_to_ptr.vmem [resolvable:$true] %s53_s18 }
   0xc   :  { %59 = dma.hbm_to_vmem [thread:$0]  %s52_s16, 10240, %s54_s18, [#allocation6], %s2716_s19, %s2716_s19, %s2717_s1  }
   0xd   :  { %2701 = dma.done.wait [#allocation3], 1024  }
   0xe   :  { %2702 = vsyncadd [#allocation3], 4294966272 }
   0xf   :  { %2703 = dma.done.wait [#allocation6], 25600  }
  0x10   :  { %2704 = vsyncadd [#allocation6], 4294941696  ;;  %v2718_v0 = vmov 0   ;;  %v74_v1 = vld [vmem:[%s3166_s0] sm:$0xff]  ;;  %v76_v2 = vld [vmem:[%s3166_s0 + $0x10] sm:$0xff]  ;;  %v79_v15 = vlaneseq  ;;  %vm602_vm8 = vcmask 1042432  }
  0x11   :  { %2572 = vset.pattern.permute.xlu0 %v2718_v0  ;;  %2573 = vset.pattern.permute.xlu1 %v2718_v0  ;;  %v78_v3 = vld [vmem:[%s3166_s0 + $0x20] sm:$0xff]  ;;  %v2437_v5 = vld [vmem:[#allocation2 + $0x30] sm:$0xff]  ;;  %v75_v6 = vld [vmem:[%s3166_s0 + $0x8] sm:$0xff]  ;;  %v2719_v19 = vmov 1.0|1.0   ;;  %vm603_vm9 = vcmask 1046532  }
  0x12   :  { %2574 = vset.pattern.permute.xlu2 %v2718_v0  ;;  %82 = vperm.xlu0 %2572, %v74_v1   ;;  %v2438_v4 = vld [vmem:[#allocation2 + $0x38] sm:$0xff]  ;;  %v77_v7 = vld [vmem:[%s3166_s0 + $0x18] sm:$0xff]  ;;  %v2436_v8 = vld [vmem:[#allocation2 + $0x28] sm:$0xff]  ;;  %v80_v16 = vand.u32 127, %v79_v15  ;;  %vm940_vm11 = vcmask 1041408   ;;  %vm941_vm12 = vcmask 1045508  }
  0x13   :  { %88 = vperm.xlu1 %2573, %v76_v2   ;;  %94 = vperm.xlu2 %2574, %v78_v3   ;;  %v2435_v9 = vld [vmem:[#allocation2 + $0x20] sm:$0xff]  ;;  %v2434_v10 = vld [vmem:[#allocation2 + $0x18] sm:$0xff]  ;;  %v2433_v11 = vld [vmem:[#allocation2 + $0x10] sm:$0xff]  ;;  %vm1223_vm13 = vcmask 1040384   ;;  %vm1224_vm15 = vcmask 1044484   ;;  %s1880_s17 = sshll.u32 %s3172_s6, 4  ;;  %s1881_s17 = int_to_ptr.hbm [resolvable:$true] %s1880_s17 }
  0x14   :  { %173 = vmatpush.bf16.msra.mxu0 %v2438_v4  ;;  %v2432_v12 = vld [vmem:[#allocation2 + $0x8] sm:$0xff]  ;;  %v2431_v13 = vld [vmem:[#allocation2] sm:$0xff]  ;;  %v2095_v25 = vld [vmem:[#allocation5 + $0x350] sm:$0xf]  ;;  %s2721_s6 = smov [#allocation9]   ;;  %s1891_s4 = sshll.u32 %s3173_s7, 4  ;;  %s1892_s4 = int_to_ptr.hbm [resolvable:$true] %s1891_s4 }
  0x15   :  { %v2087_v20 = vld [vmem:[#allocation5 + $0x348] sm:$0xf]  ;;  %v2476_v21 = vld [vmem:[#allocation5 + $0x380] sm:$0xf0]  ;;  %v2474_v23 = vld [vmem:[#allocation5 + $0x34c] sm:$0xf] }
  0x16   :  { %v2088_v22 = vor.u32 %v2476_v21, %v2087_v20  ;;  %v2089_v24 = vld [vmem:[#allocation5 + $0x384] sm:$0xf0]  ;;  %v2477_v27 = vld [vmem:[#allocation5 + $0x388] sm:$0xf0]  ;;  %v2067_v28 = vld [vmem:[#allocation5 + $0x2d0] sm:$0xf] }
  0x17   :  { %v2092_v26 = vor.u32 %v2474_v23, %v2089_v24  ;;  %v2471_v29 = vld [vmem:[#allocation5 + $0x308] sm:$0xf0]  ;;  %v2096_v30 = vor.u32 %v2477_v27, %v2095_v25  ;;  %v2469_v32 = vld [vmem:[#allocation5 + $0x2d4] sm:$0xf]  ;;  %v2069_v33 = vld [vmem:[#allocation5 + $0x30c] sm:$0xf0] }
  0x18   :  { %174 = vmatpush.bf16.msra.mxu0 %v2437_v5  ;;  %487 = vmatpush.bf16.msra.mxu1 %v2088_v22  ;;  %v2068_v31 = vor.u32 %v2471_v29, %v2067_v28  ;;  %v2075_v34 = vld [vmem:[#allocation5 + $0x2d8] sm:$0xf]  ;;  %v2072_v35 = vor.u32 %v2469_v32, %v2069_v33  ;;  %v2472_v36 = vld [vmem:[#allocation5 + $0x310] sm:$0xf0]  ;;  %v2464_v40 = vld [vmem:[#allocation5 + $0x25c] sm:$0xf] }
  0x19   :  { %506 = vmatpush.bf16.msra.mxu2 %v2092_v26  ;;  %v2047_v37 = vld [vmem:[#allocation5 + $0x258] sm:$0xf]  ;;  %v2466_v38 = vld [vmem:[#allocation5 + $0x290] sm:$0xf0]  ;;  %525 = vmatpush.bf16.msra.mxu3 %v2096_v30  ;;  %v2076_v39 = vor.u32 %v2472_v36, %v2075_v34  ;;  %v2055_v42 = vld [vmem:[#allocation5 + $0x260] sm:$0xf] }
  0x1a   :  { %85 = vperm.xlu0 %2572, %v75_v6   ;;  %v2049_v41 = vld [vmem:[#allocation5 + $0x294] sm:$0xf0]  ;;  %v2467_v43 = vld [vmem:[#allocation5 + $0x298] sm:$0xf0]  ;;  %v2507_v44 = vld [vmem:[#allocation5 + $0x360] sm:$0xf]  ;;  %v2048_v46 = vor.u32 %v2466_v38, %v2047_v37 }
  0x1b   :  { %91 = vperm.xlu1 %2573, %v77_v7   ;;  %v2223_v45 = vld [vmem:[#allocation5 + $0x398] sm:$0xf0]  ;;  %v2052_v48 = vor.u32 %v2464_v40, %v2049_v41  ;;  %v2056_v50 = vor.u32 %v2467_v43, %v2055_v42  ;;  %v2027_v52 = vld [vmem:[#allocation5 + $0x1e0] sm:$0xf]  ;;  %v2459_v54 = vld [vmem:[#allocation5 + $0x1e4] sm:$0xf] }
  0x1c   :  { %175 = vmatpush.bf16.msra.mxu0 %v2436_v8  ;;  %488 = vmatpush.bf16.msra.mxu1 %v2068_v31  ;;  %v2226_v47 = vor.u32 %v2507_v44, %v2223_v45  ;;  %v2461_v53 = vld [vmem:[#allocation5 + $0x218] sm:$0xf0]  ;;  %v2029_v56 = vld [vmem:[#allocation5 + $0x21c] sm:$0xf0]  ;;  %v2035_v57 = vld [vmem:[#allocation5 + $0x1e8] sm:$0xf] }
  0x1d   :  { %507 = vmatpush.bf16.msra.mxu2 %v2072_v35  ;;  %526 = vmatpush.bf16.msra.mxu3 %v2076_v39  ;;  %v2028_v55 = vor.u32 %v2461_v53, %v2027_v52  ;;  %v2462_v58 = vld [vmem:[#allocation5 + $0x220] sm:$0xf0]  ;;  %v2032_v59 = vor.u32 %v2459_v54, %v2029_v56  ;;  %v2503_v61 = vld [vmem:[#allocation5 + $0x2e8] sm:$0xf]  ;;  %v2454_v3 = vld [vmem:[#allocation5 + $0x16c] sm:$0xf] }
  0x1e   :  { %v2036_v60 = vor.u32 %v2462_v58, %v2035_v57  ;;  %v2207_v62 = vld [vmem:[#allocation5 + $0x320] sm:$0xf0]  ;;  %v2007_v0 = vld [vmem:[#allocation5 + $0x168] sm:$0xf]  ;;  %v2015_v6 = vld [vmem:[#allocation5 + $0x170] sm:$0xf] }
  0x1f   :  { %v2210_v63 = vor.u32 %v2503_v61, %v2207_v62  ;;  %v2456_v1 = vld [vmem:[#allocation5 + $0x1a0] sm:$0xf0]  ;;  %v2009_v4 = vld [vmem:[#allocation5 + $0x1a4] sm:$0xf0]  ;;  %v2457_v7 = vld [vmem:[#allocation5 + $0x1a8] sm:$0xf0] }
  0x20   :  { %176 = vmatpush.bf16.msra.mxu0 %v2435_v9  ;;  %489 = vmatpush.bf16.msra.mxu1 %v2048_v46  ;;  %v2008_v2 = vor.u32 %v2456_v1, %v2007_v0  ;;  %v2012_v5 = vor.u32 %v2454_v3, %v2009_v4  ;;  %v2016_v8 = vor.u32 %v2457_v7, %v2015_v6  ;;  %v2499_v9 = vld [vmem:[#allocation5 + $0x270] sm:$0xf]  ;;  %v2495_v21 = vld [vmem:[#allocation5 + $0x1f8] sm:$0xf]  ;;  %v2175_v22 = vld [vmem:[#allocation5 + $0x230] sm:$0xf0] }
  0x21   :  { %508 = vmatpush.bf16.msra.mxu2 %v2052_v48  ;;  %527 = vmatpush.bf16.msra.mxu3 %v2056_v50  ;;  %v2178_v23 = vor.u32 %v2495_v21, %v2175_v22  ;;  %v1967_v24 = vld [vmem:[#allocation5 + $0x78] sm:$0xf]  ;;  %v2446_v25 = vld [vmem:[#allocation5 + $0xb0] sm:$0xf0]  ;;  %v2444_v26 = vld [vmem:[#allocation5 + $0x7c] sm:$0xf] }
  0x22   :  { %v1968_v27 = vor.u32 %v2446_v25, %v1967_v24  ;;  %v1969_v28 = vld [vmem:[#allocation5 + $0xb4] sm:$0xf0]  ;;  %v1975_v29 = vld [vmem:[#allocation5 + $0x80] sm:$0xf]  ;;  %v2447_v30 = vld [vmem:[#allocation5 + $0xb8] sm:$0xf0] }
  0x23   :  { %v1972_v31 = vor.u32 %v2444_v26, %v1969_v28  ;;  %v1976_v32 = vor.u32 %v2447_v30, %v1975_v29  ;;  %v2491_v33 = vld [vmem:[#allocation5 + $0x180] sm:$0xf]  ;;  %v2159_v34 = vld [vmem:[#allocation5 + $0x1b8] sm:$0xf0]  ;;  %v2439_v38 = vld [vmem:[#allocation5 + $0x4] sm:$0xf] }
  0x24   :  { %177 = vmatpush.bf16.msra.mxu0 %v2434_v10  ;;  %490 = vmatpush.bf16.msra.mxu1 %v2028_v55  ;;  %v2191_v10 = vld [vmem:[#allocation5 + $0x2a8] sm:$0xf0]  ;;  %v2162_v35 = vor.u32 %v2491_v33, %v2159_v34  ;;  %v1947_v36 = vld [vmem:[#allocation5] sm:$0xf]  ;;  %v2441_v37 = vld [vmem:[#allocation5 + $0x38] sm:$0xf0] }
  0x25   :  { %509 = vmatpush.bf16.msra.mxu2 %v2032_v59  ;;  %528 = vmatpush.bf16.msra.mxu3 %v2036_v60  ;;  %v1948_v39 = vor.u32 %v2441_v37, %v1947_v36  ;;  %v1949_v40 = vld [vmem:[#allocation5 + $0x3c] sm:$0xf0]  ;;  %v1955_v41 = vld [vmem:[#allocation5 + $0x8] sm:$0xf]  ;;  %v2442_v42 = vld [vmem:[#allocation5 + $0x40] sm:$0xf0] }
  0x26   :  { %v1952_v43 = vor.u32 %v2439_v38, %v1949_v40  ;;  %v1956_v44 = vor.u32 %v2442_v42, %v1955_v41  ;;  %v2487_v45 = vld [vmem:[#allocation5 + $0x108] sm:$0xf]  ;;  %v2143_v46 = vld [vmem:[#allocation5 + $0x140] sm:$0xf0]  ;;  %v2483_v48 = vld [vmem:[#allocation5 + $0x90] sm:$0xf] }
  0x27   :  { %v2111_v52 = vld [vmem:[#allocation5 + $0x50] sm:$0xf0]  ;;  %v2103_v54 = vld [vmem:[#allocation5 + $0x358] sm:$0xf]  ;;  %v2221_v56 = vld [vmem:[#allocation5 + $0x35c] sm:$0xf] }
  0x28   :  { %178 = vmatpush.bf16.msra.mxu0 %v2433_v11  ;;  %491 = vmatpush.bf16.msra.mxu1 %v2008_v2  ;;  %v2194_v11 = vor.u32 %v2499_v9, %v2191_v10  ;;  %v2478_v55 = vld [vmem:[#allocation5 + $0x390] sm:$0xf0]  ;;  %v2509_v60 = vld [vmem:[#allocation5 + $0x394] sm:$0xf0]  ;;  %v2097_v62 = vld [vmem:[#allocation5 + $0x38c] sm:$0xf0] }
  0x29   :  { %510 = vmatpush.bf16.msra.mxu2 %v2012_v5  ;;  %529 = vmatpush.bf16.msra.mxu3 %v2016_v8  ;;  %v2104_v59 = vor.u32 %v2478_v55, %v2103_v54  ;;  %v2475_v61 = vld [vmem:[#allocation5 + $0x354] sm:$0xf]  ;;  %v2222_v0 = vor.u32 %v2509_v60, %v2221_v56  ;;  %v2083_v2 = vld [vmem:[#allocation5 + $0x2e0] sm:$0xf]  ;;  %v2473_v3 = vld [vmem:[#allocation5 + $0x318] sm:$0xf0] }
  0x2a   :  { %v2100_v1 = vor.u32 %v2475_v61, %v2097_v62  ;;  %v2205_v4 = vld [vmem:[#allocation5 + $0x2e4] sm:$0xf]  ;;  %v2505_v5 = vld [vmem:[#allocation5 + $0x31c] sm:$0xf0]  ;;  %v2470_v6 = vld [vmem:[#allocation5 + $0x2dc] sm:$0xf]  ;;  %v2084_v7 = vor.u32 %v2473_v3, %v2083_v2 }
  0x2b   :  { %v2206_v8 = vor.u32 %v2505_v5, %v2205_v4  ;;  %v2077_v9 = vld [vmem:[#allocation5 + $0x314] sm:$0xf0]  ;;  %vm2796_vm10 = vmor %vm602_vm8, %vm603_vm9  ;;  %v2465_v25 = vld [vmem:[#allocation5 + $0x264] sm:$0xf]  ;;  %s1889_s1 = sshll.u32 %s2721_s6, 4  ;;  %s1890_s1 = int_to_ptr.vmem [resolvable:$true] %s1889_s1 }
  0x2c   :  { %179 = vmatpush.bf16.msra.mxu0 %v2432_v12  ;;  %v1987_v12 = vld [vmem:[#allocation5 + $0xf0] sm:$0xf]  ;;  %v2057_v28 = vld [vmem:[#allocation5 + $0x29c] sm:$0xf0]  ;;  %v2325_v33 = vld [vmem:[#allocation5 + $0x3a8] sm:$0xf0] }
  0x2d   :  { %vm2818_vm14 = vmor %vm940_vm11, %vm941_vm12  ;;  %v2043_v38 = vld [vmem:[#allocation5 + $0x1f0] sm:$0xf]  ;;  %v2173_v42 = vld [vmem:[#allocation5 + $0x1f4] sm:$0xf] }
  0x2e   :  { %v2313_v54 = vld [vmem:[#allocation5 + $0x330] sm:$0xf0]  ;;  %v2023_v55 = vld [vmem:[#allocation5 + $0x178] sm:$0xf] }
  0x2f   :  { %v2458_v4 = vld [vmem:[#allocation5 + $0x1b0] sm:$0xf0] }
  0x30   :  { %180 = vmatpush.bf16.msra.mxu0 %v2431_v13  ;;  %v2451_v13 = vld [vmem:[#allocation5 + $0x128] sm:$0xf0]  ;;  %v2024_v5 = vor.u32 %v2458_v4, %v2023_v55  ;;  %v2448_v4 = vld [vmem:[#allocation5 + $0xc0] sm:$0xf0] }
  0x31   :  { %v1988_v15 = vor.u32 %v2451_v13, %v1987_v12 }
  0x33   :  { %492 = vmatpush.bf16.msra.mxu1 %v1988_v15  ;;  %v2063_v15 = vld [vmem:[#allocation5 + $0x268] sm:$0xf] }
  0x34   :  { %867 = vmatpush.bf16.msrb.mxu0 %v2226_v47  ;;  %v2146_v47 = vor.u32 %v2487_v45, %v2143_v46 }
  0x37   :  { %493 = vmatpush.bf16.msra.mxu1 %v1968_v27 }
  0x38   :  { %868 = vmatpush.bf16.msrb.mxu0 %v2210_v63 }
  0x3b   :  { %494 = vmatpush.bf16.msra.mxu1 %v1948_v39  ;;  %v2463_v39 = vld [vmem:[#allocation5 + $0x228] sm:$0xf0] }
  0x3c   :  { %869 = vmatpush.bf16.msrb.mxu0 %v2194_v11  ;;  %v2080_v11 = vor.u32 %v2470_v6, %v2077_v9  ;;  %v2044_v41 = vor.u32 %v2463_v39, %v2043_v38  ;;  %v2157_v6 = vld [vmem:[#allocation5 + $0x17c] sm:$0xf]  ;;  %v2017_v9 = vld [vmem:[#allocation5 + $0x1ac] sm:$0xf0] }
  0x3f   :  { %544 = vmatpush.bf16.msrb.mxu1 %v2100_v1 }
  0x40   :  { %870 = vmatpush.bf16.msrb.mxu0 %v2178_v23  ;;  %v2501_v23 = vld [vmem:[#allocation5 + $0x2a4] sm:$0xf0] }
  0x43   :  { %545 = vmatpush.bf16.msrb.mxu1 %v2080_v11 }
  0x44   :  { %871 = vmatpush.bf16.msrb.mxu0 %v2162_v35 }
  0x48   :  { %872 = vmatpush.bf16.msrb.mxu0 %v2146_v47 }
  0x6d   :  { %v95_v51 = vpop.permute.xlu2 %94 }
  0x6e   :  { %vm100_vm6 = vcmp.eq.s32.totalorder %v95_v51, %v80_v16  ;;  %v2479_v51 = vld [vmem:[#allocation5 + $0x18] sm:$0xf] }
  0x6f   :  { %vm1943_vm7 = vmpackc.low %vm100_vm6, %vm100_vm6  ;;  %v2114_v57 = vor.u32 %v2479_v51, %v2111_v52  ;;  %v2529_v52 = vld [vmem:[#allocation5 + $0x2f8] sm:$0xf] }
  0x84   :  { %v83_v14 = vpop.permute.xlu0 %82 }
  0x85   :  { %vm96_vm0 = vcmp.eq.s32.totalorder %v83_v14, %v80_v16  ;;  %v89_v18 = vpop.permute.xlu1 %88  ;;  %v2449_v14 = vld [vmem:[#allocation5 + $0xf4] sm:$0xf] }
  0x86   :  { %vm98_vm3 = vcmp.eq.s32.totalorder %v89_v18, %v80_v16  ;;  %v2452_v18 = vld [vmem:[#allocation5 + $0x130] sm:$0xf0] }
  0x8c   :  { %v86_v17 = vpop.permute.xlu0 %85 }
  0x8d   :  { %vm97_vm1 = vcmp.eq.s32.totalorder %v86_v17, %v80_v16  ;;  %v92_v49 = vpop.permute.xlu1 %91  ;;  %v1995_v17 = vld [vmem:[#allocation5 + $0xf8] sm:$0xf] }
  0x8e   :  { %vm1939_vm2 = vmpackc.low %vm97_vm1, %vm96_vm0  ;;  %vm99_vm4 = vcmp.eq.s32.totalorder %v92_v49, %v80_v16  ;;  %v1989_v16 = vld [vmem:[#allocation5 + $0x12c] sm:$0xf0]  ;;  %v1996_v20 = vor.u32 %v2452_v18, %v1995_v17  ;;  %v2127_v49 = vld [vmem:[#allocation5 + $0xc8] sm:$0xf0]  ;;  %vm1656_vm1 = vcmask 1041409  }
  0x8f   :  { %1940 = vmatmul.msk.bf16.vlgmr.msra.gmra.mxu0 %vm1939_vm2, %v2719_v19  ;;  %vm1941_vm5 = vmpackc.low %vm99_vm4, %vm98_vm3  ;;  %v2130_v50 = vor.u32 %v2483_v48, %v2127_v49  ;;  %v2037_v49 = vld [vmem:[#allocation5 + $0x224] sm:$0xf0]  ;;  %vm1553_vm2 = vcmask 1046528   ;;  %vm1578_vm3 = vcmask 1045504   ;;  %vm1603_vm4 = vcmask 1044480  }
  0x90   :  { %530 = vmatpush.bf16.msra.mxu3 %v1996_v20  ;;  %vm2854_vm0 = vmor %vm1223_vm13, %vm1224_vm15 }
  0x91   :  { %873 = vmatpush.bf16.msrb.mxu0 %v2130_v50 }
  0x94   :  { %531 = vmatpush.bf16.msra.mxu3 %v1976_v32  ;;  %v2532_v32 = vld [vmem:[#allocation5 + $0x370] sm:$0xf] }
  0x95   :  { %874 = vmatpush.bf16.msrb.mxu0 %v2114_v57  ;;  %v2328_v37 = vor.u32 %v2532_v32, %v2325_v33 }
  0x98   :  { %532 = vmatpush.bf16.msra.mxu3 %v1956_v44  ;;  %v2460_v44 = vld [vmem:[#allocation5 + $0x1ec] sm:$0xf] }
  0x99   :  { %1173 = vmatpush.bf16.msra.mxu0 %v2328_v37  ;;  %v2040_v51 = vor.u32 %v2460_v44, %v2037_v49 }
  0x9c   :  { %848 = vmatpush.bf16.msrb.mxu3 %v2222_v0  ;;  %v2316_v0 = vor.u32 %v2529_v52, %v2313_v54 }
  0x9e   :  { %1174 = vmatpush.bf16.msra.mxu0 %v2316_v0  ;;  %v2289_v0 = vld [vmem:[#allocation5 + $0x240] sm:$0xf0] }
  0x9f   :  { %1942 = vmatmul.msk.bf16.gmra.mxu0 %vm1941_vm5, %v2719_v19  ;;  %vm1628_vm5 = vcmask 1043456  }
  0xa0   :  { %849 = vmatpush.bf16.msrb.mxu3 %v2206_v8  ;;  %v2455_v8 = vld [vmem:[#allocation5 + $0x174] sm:$0xf] }
  0xaf   :  { %1944 = vmatmul.msk.bf16.gmra.mxu0 %vm1943_vm7, %v2719_v19  ;;  %v1992_v19 = vor.u32 %v2449_v14, %v1989_v16  ;;  %v2468_v16 = vld [vmem:[#allocation5 + $0x2a0] sm:$0xf0] }
  0xb0   :  { %v2064_v22 = vor.u32 %v2468_v16, %v2063_v15  ;;  %v2020_v15 = vor.u32 %v2455_v8, %v2017_v9  ;;  %v2526_v16 = vld [vmem:[#allocation5 + $0x280] sm:$0xf] }
  0xb1   :  { %511 = vmatpush.bf16.msra.mxu2 %v1992_v19  ;;  %v2189_v19 = vld [vmem:[#allocation5 + $0x26c] sm:$0xf] }
  0xb2   :  { %v2190_v27 = vor.u32 %v2501_v23, %v2189_v19 }
  0xb4   :  { %850 = vmatpush.bf16.msrb.mxu3 %v2190_v27  ;;  %v2141_v27 = vld [vmem:[#allocation5 + $0x104] sm:$0xf] }
  0xb5   :  { %512 = vmatpush.bf16.msra.mxu2 %v1972_v31  ;;  %v2060_v31 = vor.u32 %v2465_v25, %v2057_v28  ;;  %v2003_v25 = vld [vmem:[#allocation5 + $0x100] sm:$0xf] }
  0xb6   :  { %v2489_v28 = vld [vmem:[#allocation5 + $0x13c] sm:$0xf0] }
  0xb7   :  { %546 = vmatpush.bf16.msrb.mxu1 %v2060_v31 }
  0xb9   :  { %513 = vmatpush.bf16.msra.mxu2 %v1952_v43  ;;  %v2497_v43 = vld [vmem:[#allocation5 + $0x22c] sm:$0xf0] }
  0xba   :  { %v2174_v50 = vor.u32 %v2497_v43, %v2173_v42 }
  0xbb   :  { %547 = vmatpush.bf16.msrb.mxu1 %v2040_v51 }
  0xbc   :  { %851 = vmatpush.bf16.msrb.mxu3 %v2174_v50 }
  0xbd   :  { %563 = vmatpush.bf16.msrb.mxu2 %v2104_v59 }
  0xbf   :  { %548 = vmatpush.bf16.msrb.mxu1 %v2020_v15  ;;  %v2125_v15 = vld [vmem:[#allocation5 + $0x8c] sm:$0xf] }
  0xc1   :  { %564 = vmatpush.bf16.msrb.mxu2 %v2084_v7  ;;  %v2493_v7 = vld [vmem:[#allocation5 + $0x1b4] sm:$0xf0] }
  0xc5   :  { %565 = vmatpush.bf16.msrb.mxu2 %v2064_v22 }
  0xc9   :  { %566 = vmatpush.bf16.msrb.mxu2 %v2044_v41 }
  0xcd   :  { %567 = vmatpush.bf16.msrb.mxu2 %v2024_v5 }
 0x10c   :  { %v2786_v53 = vpop.f32.mrf.mxu0 }
 0x10d   :  { %v2789_v58 = vrot.slane %v2786_v53, 4  ;;  %206 = vst [vmem:[#allocation1] ss:$2 sm:$0xff] %v2786_v53  ;;  %v2105_v12 = vrot.slane %v2786_v53, 9  ;;  %v2235_v29 = vrot.slane %v2786_v53, 10  ;;  %v2333_v1 = vrot.slane %v2786_v53, 11 }
 0x10e   :  { %v2158_v53 = vor.u32 %v2493_v7, %v2157_v6 }
 0x10f   :  { %208 = vst [vmem:[#allocation1 + $0x1] ss:$2 sm:$0xff] %v2789_v58  ;;  %v607_v63 = vrot.slane %v2789_v58, 5  ;;  %v945_v30 = vrot.slane %v2789_v58, 6  ;;  %v1228_v35 = vrot.slane %v2789_v58, 7 }
 0x110   :  { %852 = vmatpush.bf16.msrb.mxu3 %v2158_v53 }
 0x111   :  { %v609_v13 = vrot.slane %v607_v63, 4  ;;  %v608_v21 = vsel %vm2796_vm10, %v2105_v12, %v607_v63  ;;  %v946_v56 = vsel %vm2818_vm14, %v2235_v29, %v945_v30  ;;  %v947_v57 = vrot.slane %v945_v30, 4  ;;  %v2450_v29 = vld [vmem:[#allocation5 + $0xfc] sm:$0xf] }
 0x112   :  { %v1230_v2 = vrot.slane %v1228_v35, 4  ;;  %v1229_v30 = vsel %vm2854_vm0, %v2333_v1, %v1228_v35  ;;  %v1983_v1 = vld [vmem:[#allocation5 + $0x88] sm:$0xf] }
 0x114   :  { %v2801_v14 = vpop.f32.mrf.mxu0 }
 0x115   :  { %v2804_v17 = vrot.slane %v2801_v14, 4  ;;  %210 = vst [vmem:[#allocation1 + $0x10] ss:$2 sm:$0xff] %v2801_v14  ;;  %v610_v18 = vrot.slane %v2801_v14, 5  ;;  %v948_v45 = vrot.slane %v2801_v14, 6  ;;  %v1231_v12 = vrot.slane %v2801_v14, 7 }
 0x116   :  { %v221_v20 = vld.sshfl [vmem:[#allocation1] sm:$0xff pattern:$0x75316420] }
 0x117   :  { %631 = vst [vmem:[#allocation1] ss:$2 sm:$0xff] %v608_v21  ;;  %v611_v24 = vsel %vm2796_vm10, %v609_v13, %v610_v18  ;;  %v613_v26 = vrot.slane %v2804_v17, 5  ;;  %v612_v36 = vrot.slane %v610_v18, 4  ;;  %v949_v3 = vsel %vm2818_vm14, %v947_v57, %v948_v45  ;;  %v2301_v18 = vld [vmem:[#allocation5 + $0x2b8] sm:$0xf0] }
 0x118   :  { %212 = vst [vmem:[#allocation1 + $0x11] ss:$2 sm:$0xff] %v2804_v17  ;;  %v950_v11 = vrot.slane %v948_v45, 4  ;;  %v1234_v21 = vrot.slane %v2804_v17, 7  ;;  %v1232_v31 = vsel %vm2854_vm0, %v1230_v2, %v1231_v12  ;;  %v2872_v32 = vrot.slane %v1231_v12, 4 }
 0x119   :  { %633 = vst [vmem:[#allocation1 + $0x1] ss:$2 sm:$0xff] %v611_v24  ;;  %v615_v47 = vrot.slane %v613_v26, 4  ;;  %v614_v60 = vsel %vm2796_vm10, %v612_v36, %v613_v26  ;;  %v2304_v24 = vor.u32 %v2526_v16, %v2301_v18  ;;  %v2453_v26 = vld [vmem:[#allocation5 + $0x138] sm:$0xf0]  ;;  %v2142_v45 = vor.u32 %v2489_v28, %v2141_v27 }
 0x11a   :  { %v1997_v36 = vld [vmem:[#allocation5 + $0x134] sm:$0xf0]  ;;  %v2879_v39 = vrot.slane %v1234_v21, 4  ;;  %v2004_v42 = vor.u32 %v2453_v26, %v2003_v25  ;;  %v1984_v12 = vor.u32 %v2448_v4, %v1983_v1  ;;  %v2485_v16 = vld [vmem:[#allocation5 + $0xc4] sm:$0xf0]  ;;  %v1235_v27 = vsel %vm2854_vm0, %v2872_v32, %v1234_v21 }
 0x11b   :  { %1175 = vmatpush.bf16.msra.mxu0 %v2304_v24  ;;  %853 = vmatpush.bf16.msrb.mxu3 %v2142_v45  ;;  %v2445_v24 = vld [vmem:[#allocation5 + $0x84] sm:$0xf]  ;;  %v1977_v25 = vld [vmem:[#allocation5 + $0xbc] sm:$0xf0]  ;;  %v2520_v26 = vld [vmem:[#allocation5 + $0x190] sm:$0xf] }
 0x11c   :  { %v2823_v40 = vpop.f32.mrf.mxu0  ;;  %568 = vmatpush.bf16.msrb.mxu2 %v2004_v42  ;;  %v2109_v45 = vld [vmem:[#allocation5 + $0x14] sm:$0xf]  ;;  %v2323_v1 = vld [vmem:[#allocation5 + $0x36c] sm:$0xf]  ;;  %v2229_v4 = vld [vmem:[#allocation5 + $0x364] sm:$0xf] }
 0x11d   :  { %v2827_v46 = vrot.slane %v2823_v40, 4  ;;  %v616_v48 = vrot.slane %v2823_v40, 5  ;;  %v954_v33 = vrot.slane %v2823_v40, 6  ;;  %v1237_v49 = vrot.slane %v2823_v40, 7 }
 0x11f   :  { %v222_v59 = vld.sshfl [vmem:[#allocation1 + $0x10] sm:$0xff pattern:$0x75316420]  ;;  %214 = vst [vmem:[#allocation1 + $0x20] ss:$2 sm:$0xff] %v2827_v46  ;;  %v617_v62 = vsel %vm2796_vm10, %v615_v47, %v616_v48  ;;  %v2000_v47 = vor.u32 %v2450_v29, %v1997_v36  ;;  %v2106_v48 = vrot.slane %v2827_v46, 9 }
 0x120   :  { %635 = vst [vmem:[#allocation1 + $0x10] ss:$2 sm:$0xff] %v614_v60  ;;  %v2835_v61 = vld.sshfl [vmem:[#allocation1] sm:$0xff pattern:$0x75316420]  ;;  %v2839_v63 = vpack.c.bf16 %v222_v59, %v221_v20  ;;  %v951_v20 = vrot.slane %v2804_v17, 6  ;;  %569 = vmatpush.bf16.msrb.mxu2 %v1984_v12 }
 0x121   :  { %969 = vst [vmem:[#allocation1] ss:$2 sm:$0xff] %v946_v56  ;;  %549 = vmatpush.bf16.msrb.mxu1 %v2000_v47  ;;  %v2236_v57 = vrot.slane %v2827_v46, 10  ;;  %v2334_v2 = vrot.slane %v2827_v46, 11  ;;  %v1963_v36 = vld [vmem:[#allocation5 + $0x10] sm:$0xf] }
 0x122   :  { %971 = vst [vmem:[#allocation1 + $0x1] ss:$2 sm:$0xff] %v949_v3  ;;  %495 = vmatmul.bf16.vlgmr.msra.gmra.mxu1 %v2839_v63  ;;  %514 = vmatmul.bf16.vlgmr.msra.gmra.mxu2 %v2839_v63  ;;  %v953_v38 = vrot.slane %v951_v20, 4  ;;  %v952_v35 = vsel %vm2818_vm14, %v950_v11, %v951_v20  ;;  %v2510_v12 = vld [vmem:[#allocation5 + $0x39c] sm:$0xf0] }
 0x123   :  { %637 = vst [vmem:[#allocation1 + $0x11] ss:$2 sm:$0xff] %v617_v62  ;;  %533 = vmatmul.bf16.vlgmr.msra.gmra.mxu3 %v2839_v63 }
 0x124   :  { %v2850_v13 = vpop.f32.mrf.mxu0  ;;  %v955_v52 = vsel %vm2818_vm14, %v953_v38, %v954_v33  ;;  %v2277_v33 = vld [vmem:[#allocation5 + $0x1c8] sm:$0xf0] }
 0x125   :  { %v2861_v22 = vrot.slane %v2850_v13, 4  ;;  %216 = vst [vmem:[#allocation1 + $0x21] ss:$2 sm:$0xff] %v2850_v13  ;;  %v620_v23 = vrot.slane %v2850_v13, 5  ;;  %v958_v50 = vrot.slane %v2850_v13, 6  ;;  %v1241_v55 = vrot.slane %v2850_v13, 7 }
 0x126   :  { %v2280_v38 = vor.u32 %v2520_v26, %v2277_v33  ;;  %v2530_v33 = vld [vmem:[#allocation5 + $0x32c] sm:$0xf0] }
 0x127   :  { %218 = vst [vmem:[#allocation1 + $0x30] ss:$2 sm:$0xff] %v2861_v22  ;;  %v622_v41 = vrot.slane %v620_v23, 4  ;;  %v623_v44 = vrot.slane %v2861_v22, 5  ;;  %v621_v59 = vsel %vm2796_vm10, %v2106_v48, %v620_v23  ;;  %v960_v3 = vrot.slane %v958_v50, 4 }
 0x128   :  { %v961_v5 = vrot.slane %v2861_v22, 6  ;;  %v2906_v6 = vrot.slane %v1241_v55, 4  ;;  %v1244_v7 = vrot.slane %v2861_v22, 7  ;;  %v2126_v23 = vor.u32 %v2485_v16, %v2125_v15  ;;  %v2514_v16 = vld [vmem:[#allocation5 + $0xa0] sm:$0xf] }
 0x129   :  { %v2875_v37 = vld.sshfl [vmem:[#allocation1] sm:$0xff pattern:$0x75316420]  ;;  %v624_v62 = vsel %vm2796_vm10, %v622_v41, %v623_v44  ;;  %v625_v8 = vrot.slane %v623_v44, 4  ;;  %v959_v21 = vsel %vm2818_vm14, %v2236_v57, %v958_v50  ;;  %v2443_v44 = vld [vmem:[#allocation5 + $0x48] sm:$0xf0]  ;;  %v2230_v15 = vor.u32 %v2510_v12, %v2229_v4 }
 0x12a   :  { %1252 = vst [vmem:[#allocation1] ss:$2 sm:$0xff] %v1229_v30  ;;  %v647_v43 = vld.sshfl [vmem:[#allocation1 + $0x10] sm:$0xff pattern:$0x75316420]  ;;  %854 = vmatpush.bf16.msrb.mxu3 %v2126_v23  ;;  %v963_v32 = vrot.slane %v961_v5, 4  ;;  %v962_v47 = vsel %vm2818_vm14, %v960_v3, %v961_v5  ;;  %v1964_v48 = vor.u32 %v2443_v44, %v1963_v36 }
 0x12b   :  { %1254 = vst [vmem:[#allocation1 + $0x1] ss:$2 sm:$0xff] %v1232_v31  ;;  %v2888_v51 = vpack.c.bf16 %v647_v43, %v2835_v61  ;;  %v2523_v61 = vld [vmem:[#allocation5 + $0x208] sm:$0xf]  ;;  %v1980_v31 = vor.u32 %v2445_v24, %v1977_v25  ;;  %v2440_v50 = vld [vmem:[#allocation5 + $0xc] sm:$0xf] }
 0x12c   :  { %973 = vst [vmem:[#allocation1 + $0x10] ss:$2 sm:$0xff] %v952_v35  ;;  %v223_v54 = vld.sshfl [vmem:[#allocation1 + $0x20] sm:$0xff pattern:$0x75316420]  ;;  %v2893_v56 = vpop.f32.mrf.mxu0  ;;  %v2292_v11 = vor.u32 %v2523_v61, %v2289_v0  ;;  %570 = vmatpush.bf16.msrb.mxu2 %v1964_v48 }
 0x12d   :  { %975 = vst [vmem:[#allocation1 + $0x11] ss:$2 sm:$0xff] %v955_v52  ;;  %875 = vmatmul.bf16.vlgmr.msrb.gmra.mxu0 %v2888_v51  ;;  %v626_v60 = vrot.slane %v2893_v56, 5  ;;  %v2910_v53 = vrot.slane %v2893_v56, 4  ;;  %v964_v9 = vrot.slane %v2893_v56, 6  ;;  %550 = vmatpush.bf16.msrb.mxu1 %v1980_v31 }
 0x12e   :  { %639 = vst [vmem:[#allocation1 + $0x20] ss:$2 sm:$0xff] %v621_v59  ;;  %1176 = vmatpush.bf16.msra.mxu0 %v2292_v11  ;;  %v1957_v52 = vld [vmem:[#allocation5 + $0x44] sm:$0xf0]  ;;  %v2517_v57 = vld [vmem:[#allocation5 + $0x118] sm:$0xf] }
 0x12f   :  { %641 = vst [vmem:[#allocation1 + $0x21] ss:$2 sm:$0xff] %v624_v62  ;;  %v628_v20 = vrot.slane %v626_v60, 4  ;;  %v629_v29 = vrot.slane %v2910_v53, 5  ;;  %v627_v42 = vsel %vm2796_vm10, %v625_v8, %v626_v60  ;;  %v966_v35 = vrot.slane %v964_v9, 4 }
 0x130   :  { %220 = vst [vmem:[#allocation1 + $0x31] ss:$2 sm:$0xff] %v2893_v56  ;;  %v2265_v59 = vld [vmem:[#allocation5 + $0x150] sm:$0xf0]  ;;  %v2508_v60 = vld [vmem:[#allocation5 + $0x368] sm:$0xf]  ;;  %v965_v26 = vsel %vm2818_vm14, %v963_v32, %v964_v9 }
 0x131   :  { %v2231_v61 = vld [vmem:[#allocation5 + $0x3a0] sm:$0xf0]  ;;  %v2268_v62 = vor.u32 %v2517_v57, %v2265_v59  ;;  %v2533_v3 = vld [vmem:[#allocation5 + $0x3a4] sm:$0xf0]  ;;  %v967_v8 = vrot.slane %v2910_v53, 6 }
 0x132   :  { %v2914_v18 = vld.sshfl [vmem:[#allocation1] sm:$0xff pattern:$0x75316420]  ;;  %1177 = vmatpush.bf16.msra.mxu0 %v2280_v38  ;;  %v2234_v0 = vor.u32 %v2508_v60, %v2231_v61  ;;  %v2324_v11 = vor.u32 %v2533_v3, %v2323_v1  ;;  %v2504_v24 = vld [vmem:[#allocation5 + $0x2f0] sm:$0xf] }
 0x133   :  { %1419 = vst [vmem:[#allocation1] ss:$2 sm:$0xff] %v2789_v58  ;;  %v1238_v58 = vsel %vm2854_vm0, %v2879_v39, %v1237_v49  ;;  %v630_v39 = vsel %vm2796_vm10, %v628_v20, %v629_v29  ;;  %v2481_v49 = vld [vmem:[#allocation5 + $0x4c] sm:$0xf0]  ;;  %v2253_v20 = vld [vmem:[#allocation5 + $0xd8] sm:$0xf0] }
 0x134   :  { %1421 = vst [vmem:[#allocation1 + $0x1] ss:$2 sm:$0xff] %v2801_v14  ;;  %v2923_v28 = vld.sshfl [vmem:[#allocation1 + $0x10] sm:$0xff pattern:$0x75316420]  ;;  %v194_v30 = vpop.f32.mrf.mxu0  ;;  %v2110_v10 = vor.u32 %v2481_v49, %v2109_v45  ;;  %905 = vmatpush.bf16.msra.mxu2 %v2234_v0  ;;  %v2256_v23 = vor.u32 %v2514_v16, %v2253_v20 }
 0x135   :  { %1256 = vst [vmem:[#allocation1 + $0x10] ss:$2 sm:$0xff] %v1235_v27  ;;  %v2215_v25 = vld [vmem:[#allocation5 + $0x328] sm:$0xf0]  ;;  %v1247_v27 = vrot.slane %v2893_v56, 7 }
 0x136   :  { %1258 = vst [vmem:[#allocation1 + $0x11] ss:$2 sm:$0xff] %v1238_v58  ;;  %v648_v14 = vld.sshfl [vmem:[#allocation1 + $0x20] sm:$0xff pattern:$0x75316420]  ;;  %855 = vmatpush.bf16.msrb.mxu3 %v2110_v10  ;;  %1178 = vmatpush.bf16.msra.mxu0 %v2268_v62 }
 0x137   :  { %v224_v41 = vld.sshfl [vmem:[#allocation1 + $0x30] sm:$0xff pattern:$0x75316420]  ;;  %977 = vst [vmem:[#allocation1 + $0x20] ss:$2 sm:$0xff] %v959_v21 }
 0x138   :  { %643 = vst [vmem:[#allocation1 + $0x30] ss:$2 sm:$0xff] %v627_v42  ;;  %v2937_v43 = vpack.c.bf16 %v224_v41, %v223_v54  ;;  %v1960_v54 = vor.u32 %v2440_v50, %v1957_v52  ;;  %v2311_v30 = vld [vmem:[#allocation5 + $0x2f4] sm:$0xf]  ;;  %v2213_v36 = vld [vmem:[#allocation5 + $0x2ec] sm:$0xf] }
 0x139   :  { %645 = vst [vmem:[#allocation1 + $0x31] ss:$2 sm:$0xff] %v630_v39  ;;  %v2312_v9 = vor.u32 %v2530_v33, %v2311_v30  ;;  %v2506_v21 = vld [vmem:[#allocation5 + $0x324] sm:$0xf0]  ;;  %v2241_v41 = vld [vmem:[#allocation5 + $0x60] sm:$0xf0] }
 0x13a   :  { %500 = vmatmul.bf16.gmra.mxu1 %v2937_v43  ;;  %519 = vmatmul.bf16.gmra.mxu2 %v2937_v43  ;;  %979 = vst [vmem:[#allocation1 + $0x21] ss:$2 sm:$0xff] %v962_v47  ;;  %v2511_v32 = vld [vmem:[#allocation5 + $0x28] sm:$0xf]  ;;  %v2214_v38 = vor.u32 %v2506_v21, %v2213_v36  ;;  %v2199_v42 = vld [vmem:[#allocation5 + $0x2b0] sm:$0xf0] }
 0x13b   :  { %538 = vmatmul.bf16.gmra.mxu3 %v2937_v43  ;;  %551 = vmatpush.bf16.msrb.mxu1 %v1960_v54  ;;  %v2244_v34 = vor.u32 %v2511_v32, %v2241_v41  ;;  %v2527_v39 = vld [vmem:[#allocation5 + $0x2b4] sm:$0xf0]  ;;  %v2197_v44 = vld [vmem:[#allocation5 + $0x274] sm:$0xf]  ;;  %v2502_v47 = vld [vmem:[#allocation5 + $0x2ac] sm:$0xf0] }
 0x13c   :  { %1154 = vmatpush.bf16.msra.mxu3 %v2324_v11  ;;  %1179 = vmatpush.bf16.msra.mxu0 %v2256_v23  ;;  %v2429_v48 = vld [vmem:[#allocation5 + $0x380] sm:$0xf]  ;;  %v2558_v49 = vld [vmem:[#allocation5 + $0x3b8] sm:$0xf0]  ;;  %v2198_v50 = vor.u32 %v2502_v47, %v2197_v44  ;;  %v2287_v54 = vld [vmem:[#allocation5 + $0x204] sm:$0xf]  ;;  %v1245_v47 = vsel %vm2854_vm0, %v2906_v6, %v1244_v7 }
 0x13d   :  { %v1268_v5 = vld.sshfl [vmem:[#allocation1 + $0x10] sm:$0xff pattern:$0x75316420]  ;;  %v2430_v10 = vor.u32 %v2558_v49, %v2429_v48  ;;  %v2496_v52 = vld [vmem:[#allocation5 + $0x200] sm:$0xf]  ;;  %v2989_v49 = vpack.c.bf16 %v2923_v28, %v2875_v37 }
 0x13e   :  { %1423 = vst [vmem:[#allocation1 + $0x10] ss:$2 sm:$0xff] %v2804_v17  ;;  %v2218_v17 = vor.u32 %v2504_v24, %v2215_v25  ;;  %v2953_v31 = vpack.c.bf16 %v1268_v5, %v2914_v18  ;;  %v2500_v18 = vld [vmem:[#allocation5 + $0x278] sm:$0xf]  ;;  %v2183_v57 = vld [vmem:[#allocation5 + $0x238] sm:$0xf0] }
 0x13f   :  { %1425 = vst [vmem:[#allocation1 + $0x11] ss:$2 sm:$0xff] %v2823_v40  ;;  %886 = vmatpush.bf16.msra.mxu1 %v2230_v15  ;;  %v968_v40 = vsel %vm2818_vm14, %v966_v35, %v967_v8  ;;  %v2202_v35 = vor.u32 %v2500_v18, %v2199_v42  ;;  %v2186_v59 = vor.u32 %v2496_v52, %v2183_v57  ;;  %v2524_v60 = vld [vmem:[#allocation5 + $0x23c] sm:$0xf0]  ;;  %v2181_v61 = vld [vmem:[#allocation5 + $0x1fc] sm:$0xf] }
 0x140   :  { %v649_v29 = vld.sshfl [vmem:[#allocation1 + $0x30] sm:$0xff pattern:$0x75316420]  ;;  %906 = vmatpush.bf16.msra.mxu2 %v2218_v17  ;;  %1155 = vmatpush.bf16.msra.mxu3 %v2312_v9  ;;  %v2498_v62 = vld [vmem:[#allocation5 + $0x234] sm:$0xf0]  ;;  %v2288_v0 = vor.u32 %v2524_v60, %v2287_v54  ;;  %v1249_v24 = vrot.slane %v1247_v27, 4 }
 0x141   :  { %v2957_v58 = vpack.c.bf16 %v649_v29, %v648_v14  ;;  %981 = vst [vmem:[#allocation1 + $0x30] ss:$2 sm:$0xff] %v965_v26  ;;  %v2299_v14 = vld [vmem:[#allocation5 + $0x27c] sm:$0xf]  ;;  %1180 = vmatpush.bf16.msra.mxu0 %v2244_v34  ;;  %v2425_v1 = vld [vmem:[#allocation5 + $0x308] sm:$0xf]  ;;  %v2182_v5 = vor.u32 %v2498_v62, %v2181_v61  ;;  %v1242_v34 = vsel %vm2854_vm0, %v2334_v2, %v1241_v55 }
 0x142   :  { %983 = vst [vmem:[#allocation1 + $0x31] ss:$2 sm:$0xff] %v968_v40  ;;  %v2300_v45 = vor.u32 %v2527_v39, %v2299_v14  ;;  %v2557_v3 = vld [vmem:[#allocation5 + $0x340] sm:$0xf0]  ;;  %v2492_v4 = vld [vmem:[#allocation5 + $0x188] sm:$0xf] }
 0x143   :  { %880 = vmatmul.bf16.gmra.mxu0 %v2957_v58  ;;  %887 = vmatpush.bf16.msra.mxu1 %v2214_v38  ;;  %v2426_v8 = vor.u32 %v2557_v3, %v2425_v1  ;;  %v2167_v11 = vld [vmem:[#allocation5 + $0x1c0] sm:$0xf0]  ;;  %v2275_v12 = vld [vmem:[#allocation5 + $0x18c] sm:$0xf]  ;;  %v2521_v15 = vld [vmem:[#allocation5 + $0x1c4] sm:$0xf0] }
 0x144   :  { %907 = vmatpush.bf16.msra.mxu2 %v2202_v35  ;;  %1156 = vmatpush.bf16.msra.mxu3 %v2300_v45  ;;  %v2165_v16 = vld [vmem:[#allocation5 + $0x184] sm:$0xf]  ;;  %v2494_v20 = vld [vmem:[#allocation5 + $0x1bc] sm:$0xf0]  ;;  %v2421_v23 = vld [vmem:[#allocation5 + $0x290] sm:$0xf]  ;;  %v2170_v26 = vor.u32 %v2492_v4, %v2167_v11  ;;  %v2276_v30 = vor.u32 %v2521_v15, %v2275_v12 }
 0x145   :  { %1508 = vmatpush.bf16.msrb.mxu0 %v2430_v10  ;;  %v1250_v25 = vrot.slane %v2910_v53, 7  ;;  %v2556_v29 = vld [vmem:[#allocation5 + $0x2c8] sm:$0xf0]  ;;  %v2488_v17 = vld [vmem:[#allocation5 + $0x110] sm:$0xf]  ;;  %v2166_v9 = vor.u32 %v2494_v20, %v2165_v16  ;;  %v1246_v35 = vrot.slane %v1244_v7, 4 }
 0x146   :  { %v2422_v40 = vor.u32 %v2556_v29, %v2421_v23  ;;  %v2151_v33 = vld [vmem:[#allocation5 + $0x148] sm:$0xf0]  ;;  %v2518_v36 = vld [vmem:[#allocation5 + $0x14c] sm:$0xf0]  ;;  %v2417_v32 = vld [vmem:[#allocation5 + $0x218] sm:$0xf] }
 0x147   :  { %888 = vmatpush.bf16.msra.mxu1 %v2198_v50  ;;  %v2149_v21 = vld [vmem:[#allocation5 + $0x10c] sm:$0xf]  ;;  %v2555_v38 = vld [vmem:[#allocation5 + $0x250] sm:$0xf0]  ;;  %v2490_v41 = vld [vmem:[#allocation5 + $0x144] sm:$0xf0]  ;;  %v2154_v14 = vor.u32 %v2488_v17, %v2151_v33  ;;  %v1248_v2 = vsel %vm2854_vm0, %v1246_v35, %v1247_v27  ;;  %v1251_v10 = vsel %vm2854_vm0, %v1249_v24, %v1250_v25 }
 0x148   :  { %908 = vmatpush.bf16.msra.mxu2 %v2186_v59  ;;  %1157 = vmatpush.bf16.msra.mxu3 %v2288_v0  ;;  %v2484_v18 = vld [vmem:[#allocation5 + $0x98] sm:$0xf]  ;;  %v2135_v42 = vld [vmem:[#allocation5 + $0xd0] sm:$0xf0]  ;;  %v2251_v39 = vld [vmem:[#allocation5 + $0x9c] sm:$0xf]  ;;  %v2418_v48 = vor.u32 %v2555_v38, %v2417_v32  ;;  %v2150_v50 = vor.u32 %v2490_v41, %v2149_v21 }
 0x149   :  { %1509 = vmatpush.bf16.msrb.mxu0 %v2426_v8  ;;  %v2515_v44 = vld [vmem:[#allocation5 + $0xd4] sm:$0xf0]  ;;  %v2981_v55 = vld.sshfl [vmem:[#allocation1 + $0x30] sm:$0xff pattern:$0x75316420]  ;;  %v2138_v54 = vor.u32 %v2484_v18, %v2135_v42 }
 0x14a   :  { %552 = vmatmul.bf16.vlgmr.msrb.gmra.mxu1 %v2839_v63  ;;  %571 = vmatmul.bf16.vlgmr.msrb.gmra.mxu2 %v2839_v63  ;;  %v2263_v63 = vld [vmem:[#allocation5 + $0x114] sm:$0xf]  ;;  %v2974_v45 = vld.sshfl [vmem:[#allocation1 + $0x20] sm:$0xff pattern:$0x75316420]  ;;  %v2252_v37 = vor.u32 %v2515_v44, %v2251_v39 }
 0x14b   :  { %856 = vmatmul.bf16.vlgmr.msrb.gmra.mxu3 %v2888_v51  ;;  %889 = vmatpush.bf16.msra.mxu1 %v2182_v5  ;;  %v2264_v46 = vor.u32 %v2518_v36, %v2263_v63  ;;  %1260 = vst [vmem:[#allocation1 + $0x20] ss:$2 sm:$0xff] %v1242_v34  ;;  %v2133_v6 = vld [vmem:[#allocation5 + $0x94] sm:$0xf]  ;;  %v2486_v7 = vld [vmem:[#allocation5 + $0xcc] sm:$0xf0]  ;;  %v3007_v44 = vpack.c.bf16 %v2981_v55, %v2974_v45 }
 0x14c   :  { %909 = vmatpush.bf16.msra.mxu2 %v2170_v26  ;;  %1158 = vmatpush.bf16.msra.mxu3 %v2276_v30  ;;  %1262 = vst [vmem:[#allocation1 + $0x21] ss:$2 sm:$0xff] %v1245_v47  ;;  %v2413_v52 = vld [vmem:[#allocation5 + $0x1a0] sm:$0xf]  ;;  %v2554_v57 = vld [vmem:[#allocation5 + $0x1d8] sm:$0xf0]  ;;  %v2134_v19 = vor.u32 %v2486_v7, %v2133_v6 }
 0x14d   :  { %1510 = vmatpush.bf16.msrb.mxu0 %v2422_v40  ;;  %1264 = vst [vmem:[#allocation1 + $0x30] ss:$2 sm:$0xff] %v1248_v2  ;;  %v2480_v27 = vld [vmem:[#allocation5 + $0x20] sm:$0xf]  ;;  %v2119_v59 = vld [vmem:[#allocation5 + $0x58] sm:$0xf0]  ;;  %v2414_v28 = vor.u32 %v2554_v57, %v2413_v52 }
 0x14e   :  { %1266 = vst [vmem:[#allocation1 + $0x31] ss:$2 sm:$0xff] %v1251_v10  ;;  %v2239_v60 = vld [vmem:[#allocation5 + $0x24] sm:$0xf]  ;;  %v2512_v61 = vld [vmem:[#allocation5 + $0x5c] sm:$0xf0]  ;;  %v2122_v11 = vor.u32 %v2480_v27, %v2119_v59 }
 0x14f   :  { %890 = vmatpush.bf16.msra.mxu1 %v2166_v9  ;;  %v2117_v62 = vld [vmem:[#allocation5 + $0x1c] sm:$0xf]  ;;  %v2482_v0 = vld [vmem:[#allocation5 + $0x54] sm:$0xf0]  ;;  %v2409_v1 = vld [vmem:[#allocation5 + $0x128] sm:$0xf]  ;;  %v2240_v23 = vor.u32 %v2512_v61, %v2239_v60 }
 0x150   :  { %910 = vmatpush.bf16.msra.mxu2 %v2154_v14  ;;  %1159 = vmatpush.bf16.msra.mxu3 %v2264_v46  ;;  %v2553_v3 = vld [vmem:[#allocation5 + $0x160] sm:$0xf0]  ;;  %v2393_v4 = vld [vmem:[#allocation5 + $0x378] sm:$0xf]  ;;  %v2550_v5 = vld [vmem:[#allocation5 + $0x3b0] sm:$0xf0]  ;;  %v2118_v26 = vor.u32 %v2482_v0, %v2117_v62 }
 0x151   :  { %1511 = vmatpush.bf16.msrb.mxu0 %v2418_v48  ;;  %v2549_v8 = vld [vmem:[#allocation5 + $0x37c] sm:$0xf]  ;;  %v2395_v12 = vld [vmem:[#allocation5 + $0x3b4] sm:$0xf0]  ;;  %v2331_v15 = vld [vmem:[#allocation5 + $0x374] sm:$0xf]  ;;  %v2410_v24 = vor.u32 %v2553_v3, %v2409_v1  ;;  %v2394_v29 = vor.u32 %v2550_v5, %v2393_v4 }
 0x152   :  { %v2534_v16 = vld [vmem:[#allocation5 + $0x3ac] sm:$0xf0]  ;;  %v2552_v17 = vld [vmem:[#allocation5 + $0xe8] sm:$0xf0]  ;;  %v2385_v30 = vld [vmem:[#allocation5 + $0x300] sm:$0xf]  ;;  %v2398_v33 = vor.u32 %v2549_v8, %v2395_v12 }
 0x153   :  { %1181 = vmatmul.bf16.vlgmr.msra.gmra.mxu0 %v2989_v49  ;;  %891 = vmatpush.bf16.msra.mxu1 %v2150_v50  ;;  %v2994_v20 = vld.sshfl [vmem:[#allocation1 + $0x20] sm:$0xff pattern:$0x75316420]  ;;  %v2405_v25 = vld [vmem:[#allocation5 + $0xb0] sm:$0xf]  ;;  %v2332_v63 = vor.u32 %v2534_v16, %v2331_v15 }
 0x154   :  { %911 = vmatpush.bf16.msra.mxu2 %v2138_v54  ;;  %1160 = vmatpush.bf16.msra.mxu3 %v2252_v37  ;;  %1427 = vst [vmem:[#allocation1 + $0x20] ss:$2 sm:$0xff] %v2850_v13  ;;  %v2548_v13 = vld [vmem:[#allocation5 + $0x338] sm:$0xf0]  ;;  %v2547_v36 = vld [vmem:[#allocation5 + $0x304] sm:$0xf]  ;;  %v2406_v9 = vor.u32 %v2552_v17, %v2405_v25 }
 0x155   :  { %1512 = vmatpush.bf16.msrb.mxu0 %v2414_v28  ;;  %v2999_v40 = vld.sshfl [vmem:[#allocation1 + $0x30] sm:$0xff pattern:$0x75316420]  ;;  %1429 = vst [vmem:[#allocation1 + $0x21] ss:$2 sm:$0xff] %v2861_v22  ;;  %v2386_v32 = vor.u32 %v2548_v13, %v2385_v30 }
 0x156   :  { %1431 = vst [vmem:[#allocation1 + $0x30] ss:$2 sm:$0xff] %v2893_v56  ;;  %v2387_v21 = vld [vmem:[#allocation5 + $0x33c] sm:$0xf0]  ;;  %v2531_v22 = vld [vmem:[#allocation5 + $0x334] sm:$0xf0] }
 0x157   :  { %892 = vmatpush.bf16.msra.mxu1 %v2134_v19  ;;  %1433 = vst [vmem:[#allocation1 + $0x31] ss:$2 sm:$0xff] %v2910_v53  ;;  %v2401_v38 = vld [vmem:[#allocation5 + $0x38] sm:$0xf]  ;;  %v2551_v41 = vld [vmem:[#allocation5 + $0x70] sm:$0xf0]  ;;  %v2390_v18 = vor.u32 %v2547_v36, %v2387_v21 }
 0x158   :  { %912 = vmatpush.bf16.msra.mxu2 %v2122_v11  ;;  %1161 = vmatpush.bf16.msra.mxu3 %v2240_v23  ;;  %v2377_v42 = vld [vmem:[#allocation5 + $0x288] sm:$0xf]  ;;  %v2546_v34 = vld [vmem:[#allocation5 + $0x2c0] sm:$0xf0]  ;;  %v2545_v35 = vld [vmem:[#allocation5 + $0x28c] sm:$0xf]  ;;  %v2402_v53 = vor.u32 %v2551_v41, %v2401_v38 }
 0x159   :  { %1513 = vmatpush.bf16.msrb.mxu0 %v2410_v24  ;;  %v2379_v14 = vld [vmem:[#allocation5 + $0x2c4] sm:$0xf0]  ;;  %v2307_v39 = vld [vmem:[#allocation5 + $0x284] sm:$0xf]  ;;  %v2378_v47 = vor.u32 %v2546_v34, %v2377_v42  ;;  %v2528_v46 = vld [vmem:[#allocation5 + $0x2bc] sm:$0xf0] }
 0x15a   :  { %557 = vmatmul.bf16.gmra.mxu1 %v2937_v43  ;;  %576 = vmatmul.bf16.gmra.mxu2 %v2937_v43  ;;  %v2319_v43 = vld [vmem:[#allocation5 + $0x2fc] sm:$0xf]  ;;  %v2382_v48 = vor.u32 %v2545_v35, %v2379_v14  ;;  %v2308_v2 = vor.u32 %v2528_v46, %v2307_v39  ;;  %v2369_v50 = vld [vmem:[#allocation5 + $0x210] sm:$0xf]  ;;  %v2544_v6 = vld [vmem:[#allocation5 + $0x248] sm:$0xf0] }
 0x15b   :  { %861 = vmatmul.bf16.gmra.mxu3 %v2957_v58  ;;  %893 = vmatpush.bf16.msra.mxu1 %v2118_v26  ;;  %v2320_v56 = vor.u32 %v2531_v22, %v2319_v43  ;;  %v2295_v7 = vld [vmem:[#allocation5 + $0x20c] sm:$0xf]  ;;  %v2525_v10 = vld [vmem:[#allocation5 + $0x244] sm:$0xf0]  ;;  %v2370_v52 = vor.u32 %v2544_v6, %v2369_v50  ;;  %v2543_v57 = vld [vmem:[#allocation5 + $0x214] sm:$0xf] }
 0x15c   :  { %1373 = vmatpush.bf16.msrb.mxu2 %v2394_v29  ;;  %1392 = vmatpush.bf16.msrb.mxu3 %v2398_v33  ;;  %v2371_v54 = vld [vmem:[#allocation5 + $0x24c] sm:$0xf0]  ;;  %v2361_v45 = vld [vmem:[#allocation5 + $0x198] sm:$0xf]  ;;  %v2542_v55 = vld [vmem:[#allocation5 + $0x1d0] sm:$0xf0]  ;;  %v2296_v27 = vor.u32 %v2525_v10, %v2295_v7 }
 0x15d   :  { %1514 = vmatpush.bf16.msrb.mxu0 %v2406_v9  ;;  %v2374_v59 = vor.u32 %v2543_v57, %v2371_v54  ;;  %v2283_v37 = vld [vmem:[#allocation5 + $0x194] sm:$0xf]  ;;  %v2522_v28 = vld [vmem:[#allocation5 + $0x1cc] sm:$0xf0]  ;;  %v2362_v60 = vor.u32 %v2542_v55, %v2361_v45  ;;  %v2541_v61 = vld [vmem:[#allocation5 + $0x19c] sm:$0xf] }
 0x15e   :  { %v2363_v62 = vld [vmem:[#allocation5 + $0x1d4] sm:$0xf0]  ;;  %v2353_v19 = vld [vmem:[#allocation5 + $0x120] sm:$0xf]  ;;  %v2540_v0 = vld [vmem:[#allocation5 + $0x158] sm:$0xf0]  ;;  %v2284_v1 = vor.u32 %v2522_v28, %v2283_v37 }
 0x15f   :  { %1192 = vmatpush.bf16.msrb.mxu1 %v2332_v63  ;;  %v1435_v3 = vld.sshfl [vmem:[#allocation1 + $0x10] sm:$0xff pattern:$0x75316420]  ;;  %v2366_v4 = vor.u32 %v2541_v61, %v2363_v62  ;;  %v2271_v5 = vld [vmem:[#allocation5 + $0x11c] sm:$0xf]  ;;  %v2354_v11 = vor.u32 %v2540_v0, %v2353_v19  ;;  %v1694_v7 = vld [vmem:[#allocation7 + $0x30] sm:$0xff] }
 0x160   :  { %1374 = vmatpush.bf16.msrb.mxu2 %v2386_v32  ;;  %1393 = vmatpush.bf16.msrb.mxu3 %v2390_v18  ;;  %v2519_v8 = vld [vmem:[#allocation5 + $0x154] sm:$0xf0]  ;;  %v2539_v12 = vld [vmem:[#allocation5 + $0x124] sm:$0xf]  ;;  %v2355_v15 = vld [vmem:[#allocation5 + $0x15c] sm:$0xf0] }
 0x161   :  { %1515 = vmatpush.bf16.msrb.mxu0 %v2402_v53  ;;  %v2345_v16 = vld [vmem:[#allocation5 + $0xa8] sm:$0xf]  ;;  %v2538_v23 = vld [vmem:[#allocation5 + $0xe0] sm:$0xf0]  ;;  %v2358_v25 = vor.u32 %v2539_v12, %v2355_v15  ;;  %v2516_v29 = vld [vmem:[#allocation5 + $0xdc] sm:$0xf0] }
 0x162   :  { %v1434_v24 = vld.sshfl [vmem:[#allocation1] sm:$0xff pattern:$0x75316420]  ;;  %v2259_v26 = vld [vmem:[#allocation5 + $0xa4] sm:$0xf]  ;;  %v2346_v30 = vor.u32 %v2538_v23, %v2345_v16  ;;  %v1702_v53 = vld [vmem:[#allocation7 + $0x70] sm:$0xff] }
 0x163   :  { %1193 = vmatpush.bf16.msrb.mxu1 %v2320_v56  ;;  %1186 = vmatmul.bf16.gmra.mxu0 %v3007_v44  ;;  %v1442_v17 = vpack.c.bf16 %v1435_v3, %v1434_v24  ;;  %v2537_v33 = vld [vmem:[#allocation5 + $0xac] sm:$0xf]  ;;  %v2347_v63 = vld [vmem:[#allocation5 + $0xe4] sm:$0xf0]  ;;  %v2337_v13 = vld [vmem:[#allocation5 + $0x30] sm:$0xf]  ;;  %v2260_v9 = vor.u32 %v2516_v29, %v2259_v26 }
 0x164   :  { %1375 = vmatpush.bf16.msrb.mxu2 %v2378_v47  ;;  %1394 = vmatpush.bf16.msrb.mxu3 %v2382_v48  ;;  %v2536_v36 = vld [vmem:[#allocation5 + $0x68] sm:$0xf0]  ;;  %v2350_v21 = vor.u32 %v2537_v33, %v2347_v63  ;;  %v2513_v32 = vld [vmem:[#allocation5 + $0x64] sm:$0xf0]  ;;  %v2535_v38 = vld [vmem:[#allocation5 + $0x34] sm:$0xf] }
 0x165   :  { %v2247_v43 = vld [vmem:[#allocation5 + $0x2c] sm:$0xf]  ;;  %v2338_v22 = vor.u32 %v2536_v36, %v2337_v13  ;;  %v2339_v41 = vld [vmem:[#allocation5 + $0x6c] sm:$0xf0]  ;;  %v1703_v14 = vld [vmem:[#allocation7 + $0x78] sm:$0xff] }
 0x166   :  { %v2248_v18 = vor.u32 %v2513_v32, %v2247_v43  ;;  %v2342_v56 = vor.u32 %v2535_v38, %v2339_v41  ;;  %v1437_v42 = vld.sshfl [vmem:[#allocation1 + $0x30] sm:$0xff pattern:$0x75316420]  ;;  %v1436_v34 = vld.sshfl [vmem:[#allocation1 + $0x20] sm:$0xff pattern:$0x75316420] }
 0x167   :  { %1194 = vmatpush.bf16.msrb.mxu1 %v2308_v2  ;;  %v1443_v35 = vpack.c.bf16 %v1437_v42, %v1436_v34  ;;  %v1701_v39 = vld [vmem:[#allocation7 + $0x68] sm:$0xff]  ;;  %v1700_v47 = vld [vmem:[#allocation7 + $0x60] sm:$0xff]  ;;  %v1698_v2 = vld [vmem:[#allocation7 + $0x50] sm:$0xff] }
 0x168   :  { %1376 = vmatpush.bf16.msrb.mxu2 %v2370_v52  ;;  %1395 = vmatpush.bf16.msrb.mxu3 %v2374_v59  ;;  %v1697_v50 = vld [vmem:[#allocation7 + $0x48] sm:$0xff]  ;;  %v1692_v55 = vld [vmem:[#allocation7 + $0x20] sm:$0xff]  ;;  %v1691_v59 = vld [vmem:[#allocation7 + $0x18] sm:$0xff] }
 0x169   :  { %v1693_v54 = vld [vmem:[#allocation7 + $0x28] sm:$0xff]  ;;  %v1690_v28 = vld [vmem:[#allocation7 + $0x10] sm:$0xff]  ;;  %v1688_v3 = vld [vmem:[#allocation7] sm:$0xff] }
 0x16a   :  { %894 = vmatmul.bf16.vlgmr.msra.gmra.mxu1 %v2888_v51  ;;  %913 = vmatmul.bf16.vlgmr.msra.gmra.mxu2 %v2888_v51  ;;  %v2272_v51 = vor.u32 %v2519_v8, %v2271_v5  ;;  %v1689_v19 = vld [vmem:[#allocation7 + $0x8] sm:$0xff]  ;;  %v1719_v24 = vld [vmem:[#allocation7 + $0xf8] sm:$0xff]  ;;  %v1716_v34 = vld [vmem:[#allocation7 + $0xe0] sm:$0xff] }
 0x16b   :  { %1162 = vmatmul.bf16.vlgmr.msra.gmra.mxu3 %v2989_v49  ;;  %1195 = vmatpush.bf16.msrb.mxu1 %v2296_v27  ;;  %v1717_v29 = vld [vmem:[#allocation7 + $0xe8] sm:$0xff]  ;;  %v2575_v33 = vld [vmem:[%s3169_s3] ss:$0 sm:$0xff] }
 0x16c   :  { %1377 = vmatpush.bf16.msrb.mxu2 %v2362_v60  ;;  %1396 = vmatpush.bf16.msrb.mxu3 %v2366_v4 }
 0x16f   :  { %1196 = vmatpush.bf16.msrb.mxu1 %v2284_v1 }
 0x170   :  { %1378 = vmatpush.bf16.msrb.mxu2 %v2354_v11  ;;  %1397 = vmatpush.bf16.msrb.mxu3 %v2358_v25 }
 0x173   :  { %1516 = vmatmul.bf16.vlgmr.msrb.gmra.mxu0 %v1442_v17  ;;  %1197 = vmatpush.bf16.msrb.mxu1 %v2272_v51  ;;  %v1718_v51 = vld [vmem:[#allocation7 + $0xf0] sm:$0xff] }
 0x174   :  { %1379 = vmatpush.bf16.msrb.mxu2 %v2346_v30  ;;  %1398 = vmatpush.bf16.msrb.mxu3 %v2350_v21 }
 0x177   :  { %1198 = vmatpush.bf16.msrb.mxu1 %v2260_v9 }
 0x178   :  { %1380 = vmatpush.bf16.msrb.mxu2 %v2338_v22  ;;  %1399 = vmatpush.bf16.msrb.mxu3 %v2342_v56 }
 0x17a   :  { %899 = vmatmul.bf16.gmra.mxu1 %v2957_v58  ;;  %918 = vmatmul.bf16.gmra.mxu2 %v2957_v58  ;;  %v1276_v58 = vpack.c.bf16 %v2999_v40, %v2994_v20  ;;  %v1696_v20 = vld [vmem:[#allocation7 + $0x40] sm:$0xff] }
 0x17b   :  { %1167 = vmatmul.bf16.gmra.mxu3 %v3007_v44  ;;  %1199 = vmatpush.bf16.msrb.mxu1 %v2248_v18 }
 0x17c   :  { %1792 = vmatpush.msra.mxu2 %v1719_v24 }
 0x17e   :  { %1793 = vmatpush.msra.mxu2 %v1718_v51 }
 0x17f   :  { %1772 = vmatpush.msra.mxu1 %v1703_v14 }
 0x180   :  { %1794 = vmatpush.msra.mxu2 %v1717_v29 }
 0x181   :  { %1773 = vmatpush.msra.mxu1 %v1702_v53 }
 0x182   :  { %1795 = vmatpush.msra.mxu2 %v1716_v34 }
 0x183   :  { %1521 = vmatmul.bf16.gmra.mxu0 %v1443_v35  ;;  %1774 = vmatpush.msra.mxu1 %v1701_v39  ;;  %v1715_v35 = vld [vmem:[#allocation7 + $0xd8] sm:$0xff]  ;;  %v1714_v39 = vld [vmem:[#allocation7 + $0xd0] sm:$0xff] }
 0x184   :  { %1796 = vmatpush.msra.mxu2 %v1715_v35 }
 0x185   :  { %1775 = vmatpush.msra.mxu1 %v1700_v47 }
 0x186   :  { %1797 = vmatpush.msra.mxu2 %v1714_v39  ;;  %v1732_v39 = vld [vmem:[#allocation7 + $0x160] sm:$0xff] }
 0x18a   :  { %1200 = vmatmul.bf16.vlgmr.msrb.gmra.mxu1 %v2989_v49  ;;  %1381 = vmatmul.bf16.vlgmr.msrb.gmra.mxu2 %v2953_v31  ;;  %v1699_v49 = vld [vmem:[#allocation7 + $0x58] sm:$0xff] }
 0x18b   :  { %1400 = vmatmul.bf16.vlgmr.msrb.gmra.mxu3 %v2953_v31  ;;  %1776 = vmatpush.msra.mxu1 %v1699_v49 }
 0x18d   :  { %1777 = vmatpush.msra.mxu1 %v1698_v2 }
 0x18f   :  { %1778 = vmatpush.msra.mxu1 %v1697_v50  ;;  %v1712_v50 = vld [vmem:[#allocation7 + $0xc0] sm:$0xff] }
 0x191   :  { %1779 = vmatpush.msra.mxu1 %v1696_v20 }
 0x19a   :  { %1205 = vmatmul.bf16.gmra.mxu1 %v3007_v44  ;;  %1386 = vmatmul.bf16.gmra.mxu2 %v1276_v58  ;;  %v1695_v44 = vld [vmem:[#allocation7 + $0x38] sm:$0xff] }
 0x19b   :  { %1405 = vmatmul.bf16.gmra.mxu3 %v1276_v58  ;;  %1780 = vmatpush.msra.mxu1 %v1695_v44 }
 0x19d   :  { %1781 = vmatpush.msra.mxu1 %v1694_v7 }
 0x19f   :  { %v496_v46 = vpop.f32.mrf.mxu1  ;;  %1782 = vmatpush.msra.mxu1 %v1693_v54  ;;  %v1709_v54 = vld [vmem:[#allocation7 + $0xa8] sm:$0xff] }
 0x1a1   :  { %1783 = vmatpush.msra.mxu1 %v1692_v55 }
 0x1a3   :  { %1784 = vmatpush.msra.mxu1 %v1691_v59  ;;  %v1707_v59 = vld [vmem:[#allocation7 + $0x98] sm:$0xff] }
 0x1a5   :  { %v3022_v48 = vpop.f32.mrf.mxu2  ;;  %1785 = vmatpush.msra.mxu1 %v1690_v28 }
 0x1a6   :  { %v3024_v31 = vpop.f32.mrf.mxu3 }
 0x1a7   :  { %v498_v6 = vpop.f32.mrf.mxu1  ;;  %1786 = vmatpush.msra.mxu1 %v1689_v19 }
 0x1a8   :  { %v1531_v40 = vmax.f32 %v496_v46, %v498_v6  ;;  %v1713_v46 = vld [vmem:[#allocation7 + $0xc8] sm:$0xff] }
 0x1a9   :  { %1787 = vmatpush.msra.mxu1 %v1688_v3  ;;  %1798 = vmatpush.msra.mxu2 %v1713_v46  ;;  %v1735_v3 = vld [vmem:[#allocation7 + $0x178] sm:$0xff] }
 0x1aa   :  { %v1532_v52 = vrot.slane %v1531_v40, 4  ;;  %v3028_v37 = vpop.f32.mrf.mxu0  ;;  %1812 = vmatpush.msra.mxu3 %v1735_v3 }
 0x1ab   :  { %1799 = vmatpush.msra.mxu2 %v1712_v50 }
 0x1ac   :  { %v1533_v27 = vmax.f32 %v1531_v40, %v1532_v52  ;;  %v1711_v40 = vld [vmem:[#allocation7 + $0xb8] sm:$0xff] }
 0x1ad   :  { %v517_v10 = vpop.f32.mrf.mxu2  ;;  %1800 = vmatpush.msra.mxu2 %v1711_v40 }
 0x1ae   :  { %v3026_v57 = vpop.f32.mrf.mxu3  ;;  %v1534_v61 = vrot.slane %v1533_v27, 2 }
 0x1b0   :  { %v1535_v4 = vmax.f32 %v1533_v27, %v1534_v61  ;;  %v1708_v27 = vld [vmem:[#allocation7 + $0xa0] sm:$0xff] }
 0x1b2   :  { %v1536_v12 = vrot.slane %v1535_v4, 1  ;;  %v3036_v15 = vpop.f32.mrf.mxu0 }
 0x1b4   :  { %v1537_v17 = vmax.f32 %v1535_v4, %v1536_v12  ;;  %v1734_v4 = vld [vmem:[#allocation7 + $0x170] sm:$0xff]  ;;  %v1705_v12 = vld [vmem:[#allocation7 + $0x88] sm:$0xff] }
 0x1b5   :  { %1813 = vmatpush.msra.mxu3 %v1734_v4  ;;  %v1725_v4 = vld [vmem:[#allocation7 + $0x128] sm:$0xff] }
 0x1b6   :  { %v1549_v43 = vadd.f32 %v2575_v33, %v1537_v17 }
 0x1b7   :  { %v501_v45 = vpop.f32.mrf.mxu1 }
 0x1b8   :  { %v1551_v38 = vmax.f32 %v1549_v43, 0.0 }
 0x1bd   :  { %v3030_v60 = vpop.f32.mrf.mxu2 }
 0x1be   :  { %v3032_v62 = vpop.f32.mrf.mxu3 }
 0x1bf   :  { %v503_v0 = vpop.f32.mrf.mxu1 }
 0x1c0   :  { %v1538_v1 = vmax.f32 %v501_v45, %v503_v0  ;;  %v3047_v9 = vpop.f32.mrf.mxu0 }
 0x1c2   :  { %v1539_v5 = vrot.slane %v1538_v1, 4 }
 0x1c4   :  { %v1540_v8 = vmax.f32 %v1538_v1, %v1539_v5  ;;  %v1706_v1 = vld [vmem:[#allocation7 + $0x90] sm:$0xff] }
 0x1c5   :  { %v3034_v11 = vpop.f32.mrf.mxu2 }
 0x1c6   :  { %v1541_v16 = vrot.slane %v1540_v8, 2  ;;  %v3038_v23 = vpop.f32.mrf.mxu3 }
 0x1c7   :  { %v3040_v25 = vpop.f32.mrf.mxu1 }
 0x1c8   :  { %v1542_v26 = vmax.f32 %v1540_v8, %v1541_v16  ;;  %v3059_v58 = vpop.f32.mrf.mxu0  ;;  %v1733_v16 = vld [vmem:[#allocation7 + $0x168] sm:$0xff] }
 0x1c9   :  { %1814 = vmatpush.msra.mxu3 %v1733_v16 }
 0x1ca   :  { %v1543_v30 = vrot.slane %v1542_v26, 1 }
 0x1cb   :  { %1815 = vmatpush.msra.mxu3 %v1732_v39  ;;  %v1720_v39 = vld [vmem:[#allocation7 + $0x100] sm:$0xff] }
 0x1cc   :  { %v1544_v63 = vmax.f32 %v1542_v26, %v1543_v30  ;;  %v1704_v26 = vld [vmem:[#allocation7 + $0x80] sm:$0xff] }
 0x1cd   :  { %v3045_v13 = vpop.f32.mrf.mxu2 }
 0x1ce   :  { %v1550_v36 = vadd.f32 %v2575_v33, %v1544_v63  ;;  %v857_v21 = vpop.f32.mrf.mxu3 }
 0x1cf   :  { %v3049_v32 = vpop.f32.mrf.mxu1  ;;  %v924_v49 = vadd.f32 %v857_v21, %v3022_v48 }
 0x1d0   :  { %v1552_v22 = vmax.f32 %v1550_v36, 0.0  ;;  %v3067_v52 = vpop.f32.mrf.mxu0 }
 0x1d2   :  { %v1655_v41 = vrot.slane %v1552_v22, 7  ;;  %v2576_v22 = vld [vmem:[%s3169_s3 + $0x1] ss:$0 sm:$0xff] }
 0x1d4   :  { %v3052_v18 = vsel %vm1656_vm1, %v1655_v41, %v1551_v38  ;;  %v929_v38 = vadd.f32 %v3036_v15, %v3026_v57  ;;  %v1730_v57 = vld [vmem:[#allocation7 + $0x150] sm:$0xff] }
 0x1d5   :  { %v3054_v56 = vpop.f32.mrf.mxu2  ;;  %1788 = vmatmul.f32.vlgmr.msra.gmra.mxu1 %v3052_v18 }
 0x1d6   :  { %v859_v42 = vpop.f32.mrf.mxu3 }
 0x1d7   :  { %v925_v14 = vadd.f32 %v859_v42, %v517_v10  ;;  %v3057_v53 = vpop.f32.mrf.mxu1  ;;  %v1710_v10 = vld [vmem:[#allocation7 + $0xb0] sm:$0xff]  ;;  %v928_v42 = vadd.f32 %v3028_v37, %v3024_v31  ;;  %v1729_v37 = vld [vmem:[#allocation7 + $0x148] sm:$0xff] }
 0x1d8   :  { %1801 = vmatpush.msra.mxu2 %v1710_v10 }
 0x1d9   :  { %v1554_v47 = vsel %vm1553_vm2, %v925_v14, -inf }
 0x1da   :  { %v1555_v2 = vmax.f32 %v924_v49, %v1554_v47  ;;  %1802 = vmatpush.msra.mxu2 %v1709_v54  ;;  %v1731_v47 = vld [vmem:[#allocation7 + $0x158] sm:$0xff]  ;;  %v1728_v54 = vld [vmem:[#allocation7 + $0x140] sm:$0xff] }
 0x1db   :  { %1816 = vmatpush.msra.mxu3 %v1731_v47  ;;  %v1748_v47 = vld [vmem:[#allocation7 + $0x1e0] sm:$0xff] }
 0x1dc   :  { %v1556_v7 = vrot.slane %v1555_v2, 4  ;;  %1803 = vmatpush.msra.mxu2 %v1708_v27 }
 0x1dd   :  { %v3063_v6 = vpop.f32.mrf.mxu2  ;;  %1817 = vmatpush.msra.mxu3 %v1730_v57 }
 0x1de   :  { %v862_v20 = vpop.f32.mrf.mxu3  ;;  %v1557_v48 = vmax.f32 %v1555_v2, %v1556_v7  ;;  %1804 = vmatpush.msra.mxu2 %v1707_v59  ;;  %v1727_v59 = vld [vmem:[#allocation7 + $0x138] sm:$0xff] }
 0x1df   :  { %v3065_v44 = vpop.f32.mrf.mxu1  ;;  %v926_v0 = vadd.f32 %v862_v20, %v3030_v60  ;;  %1818 = vmatpush.msra.mxu3 %v1729_v37 }
 0x1e0   :  { %v1558_v19 = vrot.slane %v1557_v48, 2  ;;  %1805 = vmatpush.msra.mxu2 %v1706_v1  ;;  %v1726_v1 = vld [vmem:[#allocation7 + $0x130] sm:$0xff] }
 0x1e1   :  { %1819 = vmatpush.msra.mxu3 %v1728_v54 }
 0x1e2   :  { %v1559_v24 = vmax.f32 %v1557_v48, %v1558_v19  ;;  %1806 = vmatpush.msra.mxu2 %v1705_v12 }
 0x1e3   :  { %1820 = vmatpush.msra.mxu3 %v1727_v59 }
 0x1e4   :  { %1807 = vmatpush.msra.mxu2 %v1704_v26  ;;  %v1560_v33 = vrot.slane %v1559_v24, 1  ;;  %v1724_v26 = vld [vmem:[#allocation7 + $0x120] sm:$0xff] }
 0x1e5   :  { %v3069_v45 = vpop.f32.mrf.mxu2  ;;  %1821 = vmatpush.msra.mxu3 %v1726_v1 }
 0x1e6   :  { %v864_v55 = vpop.f32.mrf.mxu3  ;;  %v1561_v21 = vmax.f32 %v1559_v24, %v1560_v33  ;;  %v930_v24 = vadd.f32 %v3047_v9, %v3032_v62  ;;  %v1721_v62 = vld [vmem:[#allocation7 + $0x108] sm:$0xff] }
 0x1e7   :  { %v927_v28 = vadd.f32 %v864_v55, %v3034_v11  ;;  %v3072_v61 = vpop.f32.mrf.mxu1  ;;  %v3076_v11 = vpop.f32.mrf.mxu0  ;;  %1822 = vmatpush.msra.mxu3 %v1725_v4  ;;  %v1749_v9 = vld [vmem:[#allocation7 + $0x1e8] sm:$0xff]  ;;  %v1764_v4 = vld [vmem:[#allocation7 + $0x260] sm:$0xff] }
 0x1e8   :  { %v1574_v50 = vadd.f32 %v2576_v22, %v1561_v21 }
 0x1e9   :  { %v1562_v5 = vsel %vm1553_vm2, %v927_v28, -inf  ;;  %1823 = vmatpush.msra.mxu3 %v1724_v26 }
 0x1ea   :  { %v1563_v8 = vmax.f32 %v926_v0, %v1562_v5  ;;  %v1576_v7 = vmax.f32 %v1574_v50, 0.0 }
 0x1ec   :  { %v1564_v51 = vrot.slane %v1563_v8, 4 }
 0x1ed   :  { %v3078_v29 = vpop.f32.mrf.mxu2 }
 0x1ee   :  { %v1565_v60 = vmax.f32 %v1563_v8, %v1564_v51  ;;  %v1163_v17 = vpop.f32.mrf.mxu3  ;;  %v931_v8 = vadd.f32 %v3059_v58, %v3038_v23  ;;  %v1751_v23 = vld [vmem:[#allocation7 + $0x1f8] sm:$0xff]  ;;  %v1750_v58 = vld [vmem:[#allocation7 + $0x1f0] sm:$0xff]  ;;  %v936_v37 = vadd.f32 %v3078_v29, %v3045_v13 }
 0x1ef   :  { %v3080_v30 = vpop.f32.mrf.mxu1  ;;  %v3091_v34 = vpop.f32.mrf.mxu0  ;;  %v1211_v2 = vadd.f32 %v1163_v17, %v928_v42  ;;  %1832 = vmatpush.msra.mxu0 %v1751_v23  ;;  %v1762_v23 = vld [vmem:[#allocation7 + $0x250] sm:$0xff] }
 0x1f0   :  { %v1566_v63 = vrot.slane %v1565_v60, 2  ;;  %v933_v57 = vadd.f32 %v3080_v30, %v3049_v32  ;;  %v2577_v32 = vld [vmem:[%s3169_s3 + $0x2] ss:$0 sm:$0xff] }
 0x1f1   :  { %1833 = vmatpush.msra.mxu0 %v1750_v58  ;;  %v1744_v58 = vld [vmem:[#allocation7 + $0x1c0] sm:$0xff] }
 0x1f2   :  { %v1567_v36 = vmax.f32 %v1565_v60, %v1566_v63  ;;  %v1723_v60 = vld [vmem:[#allocation7 + $0x118] sm:$0xff]  ;;  %v1722_v63 = vld [vmem:[#allocation7 + $0x110] sm:$0xff] }
 0x1f3   :  { %1824 = vmatpush.msra.mxu3 %v1723_v60  ;;  %1834 = vmatpush.msra.mxu0 %v1749_v9  ;;  %v1763_v60 = vld [vmem:[#allocation7 + $0x258] sm:$0xff] }
 0x1f4   :  { %v1568_v43 = vrot.slane %v1567_v36, 1 }
 0x1f5   :  { %v3087_v41 = vpop.f32.mrf.mxu2  ;;  %1825 = vmatpush.msra.mxu3 %v1722_v63  ;;  %1835 = vmatpush.msra.mxu0 %v1748_v47 }
 0x1f6   :  { %v1569_v35 = vmax.f32 %v1567_v36, %v1568_v43  ;;  %v1165_v14 = vpop.f32.mrf.mxu3  ;;  %v1767_v43 = vld [vmem:[#allocation7 + $0x278] sm:$0xff] }
 0x1f7   :  { %v1212_v49 = vadd.f32 %v1165_v14, %v929_v38  ;;  %v3093_v46 = vpop.f32.mrf.mxu1  ;;  %v3101_v19 = vpop.f32.mrf.mxu0  ;;  %1852 = vmatpush.msrb.mxu1 %v1767_v43  ;;  %1826 = vmatpush.msra.mxu3 %v1721_v62  ;;  %v1761_v62 = vld [vmem:[#allocation7 + $0x248] sm:$0xff] }
 0x1f8   :  { %v1575_v20 = vadd.f32 %v2576_v22, %v1569_v35 }
 0x1f9   :  { %v1579_v15 = vsel %vm1578_vm3, %v1212_v49, -inf  ;;  %1827 = vmatpush.msra.mxu3 %v1720_v39 }
 0x1fa   :  { %v1580_v40 = vmax.f32 %v1211_v2, %v1579_v15  ;;  %v1577_v31 = vmax.f32 %v1575_v20, 0.0 }
 0x1fc   :  { %v1661_v10 = vrot.slane %v1577_v31, 7  ;;  %v1581_v0 = vrot.slane %v1580_v40, 4  ;;  %v932_v31 = vadd.f32 %v3072_v61, %v3040_v25 }
 0x1fd   :  { %v3096_v48 = vpop.f32.mrf.mxu2 }
 0x1fe   :  { %v1168_v55 = vpop.f32.mrf.mxu3  ;;  %v1662_v27 = vsel %vm1656_vm1, %v1661_v10, %v1576_v7  ;;  %v1582_v5 = vmax.f32 %v1580_v40, %v1581_v0  ;;  %v937_v10 = vadd.f32 %v3087_v41, %v3054_v56  ;;  %v1216_v0 = vadd.f32 %v3076_v11, %v933_v57  ;;  %v1765_v56 = vld [vmem:[#allocation7 + $0x268] sm:$0xff]  ;;  %v1747_v41 = vld [vmem:[#allocation7 + $0x1d8] sm:$0xff]  ;;  %v1746_v11 = vld [vmem:[#allocation7 + $0x1d0] sm:$0xff] }
 0x1ff   :  { %1808 = vmatmul.f32.vlgmr.msra.gmra.mxu2 %v1662_v27  ;;  %v3099_v28 = vpop.f32.mrf.mxu1  ;;  %v1679_v3 = vrot.slane %v1662_v27, 6  ;;  %v1213_v21 = vadd.f32 %v1168_v55, %v930_v24  ;;  %v1517_v38 = vpop.f32.mrf.mxu0  ;;  %v1215_v30 = vadd.f32 %v3067_v52, %v932_v31  ;;  %1836 = vmatpush.msra.mxu0 %v1747_v41  ;;  %v934_v57 = vadd.f32 %v3093_v46, %v3057_v53  ;;  %v1757_v53 = vld [vmem:[#allocation7 + $0x228] sm:$0xff] }
 0x200   :  { %v1583_v36 = vrot.slane %v1582_v5, 2 }
 0x201   :  { %v3109_v16 = vsel %vm940_vm11, %v3052_v18, %v1679_v3  ;;  %v1766_v18 = vld [vmem:[#allocation7 + $0x270] sm:$0xff]  ;;  %1837 = vmatpush.msra.mxu0 %v1746_v11  ;;  %v1217_v46 = vadd.f32 %v3091_v34, %v934_v57  ;;  %v1755_v34 = vld [vmem:[#allocation7 + $0x218] sm:$0xff] }
 0x202   :  { %v1584_v35 = vmax.f32 %v1582_v5, %v1583_v36  ;;  %1853 = vmatpush.msrb.mxu1 %v1766_v18 }
 0x204   :  { %v1585_v15 = vrot.slane %v1584_v35, 1  ;;  %1854 = vmatpush.msrb.mxu1 %v1765_v56  ;;  %v1737_v56 = vld [vmem:[#allocation7 + $0x188] sm:$0xff] }
 0x205   :  { %v3105_v12 = vpop.f32.mrf.mxu2 }
 0x206   :  { %v1170_v51 = vpop.f32.mrf.mxu3  ;;  %v1586_v54 = vmax.f32 %v1584_v35, %v1585_v15  ;;  %1855 = vmatpush.msrb.mxu1 %v1764_v4  ;;  %v1743_v35 = vld [vmem:[#allocation7 + $0x1b8] sm:$0xff]  ;;  %v1741_v15 = vld [vmem:[#allocation7 + $0x1a8] sm:$0xff] }
 0x207   :  { %v1214_v17 = vadd.f32 %v1170_v51, %v931_v8  ;;  %v1201_v33 = vpop.f32.mrf.mxu1  ;;  %v1519_v55 = vpop.f32.mrf.mxu0 }
 0x208   :  { %v1219_v59 = vadd.f32 %v1201_v33, %v936_v37  ;;  %v1599_v52 = vadd.f32 %v2577_v32, %v1586_v54  ;;  %1856 = vmatpush.msrb.mxu1 %v1763_v60 }
 0x209   :  { %v1587_v22 = vsel %vm1578_vm3, %v1214_v17, -inf  ;;  %v1745_v17 = vld [vmem:[#allocation7 + $0x1c8] sm:$0xff] }
 0x20a   :  { %v1588_v42 = vmax.f32 %v1213_v21, %v1587_v22  ;;  %1838 = vmatpush.msra.mxu0 %v1745_v17  ;;  %v1601_v18 = vmax.f32 %v1599_v52, 0.0  ;;  %1857 = vmatpush.msrb.mxu1 %v1762_v23 }
 0x20c   :  { %v1589_v14 = vrot.slane %v1588_v42, 4  ;;  %1839 = vmatpush.msra.mxu0 %v1744_v58  ;;  %1858 = vmatpush.msrb.mxu1 %v1761_v62  ;;  %v2578_v62 = vld [vmem:[%s3169_s3 + $0x3] ss:$0 sm:$0xff] }
 0x20d   :  { %v1382_v49 = vpop.f32.mrf.mxu2 }
 0x20e   :  { %v1590_v2 = vmax.f32 %v1588_v42, %v1589_v14  ;;  %v1401_v50 = vpop.f32.mrf.mxu3  ;;  %v1411_v5 = vadd.f32 %v1382_v49, %v1215_v30  ;;  %1840 = vmatpush.msra.mxu0 %v1743_v35 }
 0x20f   :  { %v1203_v20 = vpop.f32.mrf.mxu1  ;;  %v1415_v29 = vadd.f32 %v1401_v50, %v1219_v59  ;;  %v1522_v14 = vpop.f32.mrf.mxu0  ;;  %v935_v50 = vadd.f32 %v3099_v28, %v3065_v44  ;;  %v1740_v44 = vld [vmem:[#allocation7 + $0x1a0] sm:$0xff] }
 0x210   :  { %v1591_v40 = vrot.slane %v1590_v2, 2  ;;  %v1220_v25 = vadd.f32 %v1203_v20, %v937_v10  ;;  %v1759_v20 = vld [vmem:[#allocation7 + $0x238] sm:$0xff]  ;;  %v939_v10 = vadd.f32 %v3105_v12, %v3069_v45  ;;  %v1756_v45 = vld [vmem:[#allocation7 + $0x220] sm:$0xff] }
 0x211   :  { %v1527_v36 = vadd.f32 %v1517_v38, %v1415_v29  ;;  %v1760_v38 = vld [vmem:[#allocation7 + $0x240] sm:$0xff] }
 0x212   :  { %v1592_v7 = vmax.f32 %v1590_v2, %v1591_v40  ;;  %v1742_v2 = vld [vmem:[#allocation7 + $0x1b0] sm:$0xff]  ;;  %1859 = vmatpush.msrb.mxu1 %v1760_v38  ;;  %v938_v40 = vadd.f32 %v3096_v48, %v3063_v6  ;;  %v1739_v6 = vld [vmem:[#allocation7 + $0x198] sm:$0xff] }
 0x213   :  { %1841 = vmatpush.msra.mxu0 %v1742_v2  ;;  %v2579_v38 = vld [vmem:[%s3169_s3 + $0x4] ss:$0 sm:$0xff]  ;;  %s2720_s3 = smov [#allocation8]  }
 0x214   :  { %v1593_v27 = vrot.slane %v1592_v7, 1  ;;  %1860 = vmatpush.msrb.mxu1 %v1759_v20  ;;  %s1878_s2 = sshll.u32 %s2720_s3, 4  ;;  %s1879_s2 = int_to_ptr.vmem [resolvable:$true] %s1878_s2 }
 0x215   :  { %v1384_v61 = vpop.f32.mrf.mxu2  ;;  %1842 = vmatpush.msra.mxu0 %v1741_v15 }
 0x216   :  { %v1594_v13 = vmax.f32 %v1592_v7, %v1593_v27  ;;  %v1412_v1 = vadd.f32 %v1384_v61, %v1216_v0  ;;  %v1403_v3 = vpop.f32.mrf.mxu3  ;;  %v1758_v7 = vld [vmem:[#allocation7 + $0x230] sm:$0xff] }
 0x217   :  { %v1416_v8 = vadd.f32 %v1403_v3, %v1220_v25  ;;  %v1206_v51 = vpop.f32.mrf.mxu1  ;;  %1861 = vmatpush.msrb.mxu1 %v1758_v7  ;;  %1843 = vmatpush.msra.mxu0 %v1740_v44 }
 0x218   :  { %v1604_v24 = vsel %vm1603_vm4, %v1412_v1, -inf  ;;  %v1600_v26 = vadd.f32 %v2577_v32, %v1594_v13  ;;  %v1221_v28 = vadd.f32 %v1206_v51, %v938_v40  ;;  %v1738_v13 = vld [vmem:[#allocation7 + $0x190] sm:$0xff]  ;;  %v1736_v51 = vld [vmem:[#allocation7 + $0x180] sm:$0xff] }
 0x219   :  { %v1605_v33 = vmax.f32 %v1411_v5, %v1604_v24  ;;  %v1528_v63 = vadd.f32 %v1519_v55, %v1416_v8  ;;  %v1218_v55 = vadd.f32 %v3101_v19, %v935_v50  ;;  %1862 = vmatpush.msrb.mxu1 %v1757_v53  ;;  %v1524_v19 = vpop.f32.mrf.mxu0  ;;  %1844 = vmatpush.msra.mxu0 %v1739_v6  ;;  %v1754_v5 = vld [vmem:[#allocation7 + $0x210] sm:$0xff] }
 0x21a   :  { %v1602_v21 = vmax.f32 %v1600_v26, 0.0  ;;  %v1753_v26 = vld [vmem:[#allocation7 + $0x208] sm:$0xff] }
 0x21b   :  { %v1629_v43 = vsel %vm1628_vm5, %v1528_v63, -inf  ;;  %v1606_v49 = vrot.slane %v1605_v33, 4  ;;  %1863 = vmatpush.msrb.mxu1 %v1756_v45  ;;  %1845 = vmatpush.msra.mxu0 %v1738_v13  ;;  %v1752_v63 = vld [vmem:[#allocation7 + $0x200] sm:$0xff] }
 0x21c   :  { %v1630_v22 = vmax.f32 %v1527_v36, %v1629_v43  ;;  %v1666_v42 = vrot.slane %v1602_v21, 7 }
 0x21d   :  { %v1387_v9 = vpop.f32.mrf.mxu2  ;;  %v1607_v54 = vmax.f32 %v1605_v33, %v1606_v49  ;;  %1864 = vmatpush.msrb.mxu1 %v1755_v34  ;;  %1846 = vmatpush.msra.mxu0 %v1737_v56 }
 0x21e   :  { %v1406_v39 = vpop.f32.mrf.mxu3  ;;  %v3130_v47 = vsel %vm1656_vm1, %v1666_v42, %v1601_v18  ;;  %v1631_v31 = vrot.slane %v1630_v22, 4  ;;  %v1413_v25 = vadd.f32 %v1387_v9, %v1217_v46 }
 0x21f   :  { %1828 = vmatmul.f32.vlgmr.msra.gmra.mxu3 %v3130_v47  ;;  %v1208_v37 = vpop.f32.mrf.mxu1  ;;  %v1417_v0 = vadd.f32 %v1406_v39, %v1221_v28  ;;  %v1608_v12 = vrot.slane %v1607_v54, 2  ;;  %1865 = vmatpush.msrb.mxu1 %v1754_v5 }
 0x220   :  { %v1222_v27 = vadd.f32 %v1208_v37, %v939_v10  ;;  %v1632_v48 = vmax.f32 %v1630_v22, %v1631_v31  ;;  %1847 = vmatpush.msra.mxu0 %v1736_v51 }
 0x221   :  { %v1529_v4 = vadd.f32 %v1522_v14, %v1417_v0  ;;  %v1609_v8 = vmax.f32 %v1607_v54, %v1608_v12  ;;  %1866 = vmatpush.msrb.mxu1 %v1753_v26 }
 0x222   :  { %v1633_v41 = vrot.slane %v1632_v48, 2 }
 0x223   :  { %v1610_v36 = vrot.slane %v1609_v8, 1  ;;  %1867 = vmatpush.msrb.mxu1 %v1752_v63 }
 0x224   :  { %v1634_v17 = vmax.f32 %v1632_v48, %v1633_v41 }
 0x225   :  { %v1389_v59 = vpop.f32.mrf.mxu2  ;;  %v1611_v18 = vmax.f32 %v1609_v8, %v1610_v36 }
 0x226   :  { %v1414_v32 = vadd.f32 %v1389_v59, %v1218_v55  ;;  %v1408_v30 = vpop.f32.mrf.mxu3  ;;  %v1635_v43 = vrot.slane %v1634_v17, 1  ;;  %v1680_v55 = vrot.slane %v3130_v47, 4 }
 0x227   :  { %v1418_v61 = vadd.f32 %v1408_v30, %v1222_v27  ;;  %v1624_v49 = vadd.f32 %v2578_v62, %v1611_v18  ;;  %v2580_v27 = vld [vmem:[%s3171_s5] ss:$0 sm:$0xff] }
 0x228   :  { %v1612_v29 = vsel %vm1603_vm4, %v1414_v32, -inf  ;;  %v1636_v39 = vmax.f32 %v1634_v17, %v1635_v43 }
 0x229   :  { %v1613_v1 = vmax.f32 %v1413_v25, %v1612_v29  ;;  %v1530_v3 = vadd.f32 %v1524_v19, %v1418_v61  ;;  %v1626_v40 = vmax.f32 %v1624_v49, 0.0 }
 0x22a   :  { %v1649_v57 = vadd.f32 %v2579_v38, %v1636_v39 }
 0x22b   :  { %v1614_v11 = vrot.slane %v1613_v1, 4  ;;  %v1637_v24 = vsel %vm1628_vm5, %v1530_v3, -inf }
 0x22c   :  { %v1638_v52 = vmax.f32 %v1529_v4, %v1637_v24  ;;  %v1651_v10 = vmax.f32 %v1649_v57, 0.0 }
 0x22d   :  { %v1615_v60 = vmax.f32 %v1613_v1, %v1614_v11 }
 0x22e   :  { %v1639_v33 = vrot.slane %v1638_v52, 4 }
 0x22f   :  { %v1616_v21 = vrot.slane %v1615_v60, 2 }
 0x230   :  { %v1640_v23 = vmax.f32 %v1638_v52, %v1639_v33 }
 0x231   :  { %v1617_v58 = vmax.f32 %v1615_v60, %v1616_v21 }
 0x232   :  { %v1641_v22 = vrot.slane %v1640_v23, 2 }
 0x233   :  { %v1618_v42 = vrot.slane %v1617_v58, 1 }
 0x234   :  { %v1642_v9 = vmax.f32 %v1640_v23, %v1641_v22 }
 0x235   :  { %v1619_v35 = vmax.f32 %v1617_v58, %v1618_v42 }
 0x236   :  { %v1643_v14 = vrot.slane %v1642_v9, 1 }
 0x237   :  { %v1625_v2 = vadd.f32 %v2578_v62, %v1619_v35 }
 0x238   :  { %v1644_v50 = vmax.f32 %v1642_v9, %v1643_v14 }
 0x239   :  { %v1627_v20 = vmax.f32 %v1625_v2, 0.0 }
 0x23a   :  { %v1650_v15 = vadd.f32 %v2579_v38, %v1644_v50 }
 0x23b   :  { %v1671_v31 = vrot.slane %v1627_v20, 7 }
 0x23c   :  { %v1652_v37 = vmax.f32 %v1650_v15, 0.0 }
 0x23d   :  { %v1672_v7 = vsel %vm1656_vm1, %v1671_v31, %v1626_v40 }
 0x23e   :  { %1848 = vmatmul.f32.vlgmr.msra.gmra.mxu0 %v1672_v7  ;;  %v1676_v54 = vrot.slane %v1652_v37, 7  ;;  %v1681_v28 = vrot.slane %v1672_v7, 2 }
 0x240   :  { %v1677_v44 = vsel %vm1656_vm1, %v1676_v54, %v1651_v10  ;;  %v1683_v53 = vsel %vm941_vm12, %v1680_v55, %v1681_v28 }
 0x241   :  { %1687 = vst [vmem:[#allocation8 + $0x8] sm:$0x3] %v1677_v44  ;;  %1868 = vmatmul.f32.vlgmr.msrb.gmra.mxu1 %v1677_v44  ;;  %v1684_v46 = vsel %vm1628_vm5, %v3109_v16, %v1683_v53 }
 0x242   :  { %1686 = vst [vmem:[#allocation8] sm:$0xff] %v1684_v46 }
 0x243   :  { %1883 = dma.vmem_to_hbm [thread:$0]  %s1879_s2, 160, %s1881_s17, [#allocation4]  }
 0x252   :  { %v1789_v59 = vpop.f32.mrf.mxu1 }
 0x253   :  { %v1790_v48 = vadd.f32 %v2580_v27, %v1789_v59 }
 0x282   :  { %v1809_v6 = vpop.f32.mrf.mxu2 }
 0x283   :  { %v1810_v32 = vadd.f32 %v1809_v6, %v1790_v48 }
 0x2a2   :  { %v1829_v0 = vpop.f32.mrf.mxu3 }
 0x2a3   :  { %v1830_v30 = vadd.f32 %v1829_v0, %v1810_v32 }
 0x2bb   :  { %v1849_v47 = vpop.f32.mrf.mxu0 }
 0x2bc   :  { %v1850_v45 = vadd.f32 %v1849_v47, %v1830_v30 }
 0x2be   :  { %v1869_v16 = vpop.f32.mrf.mxu1 }
 0x2bf   :  { %v1870_v12 = vadd.f32 %v1869_v16, %v1850_v45 }
 0x2c1   :  { %1872 = vst [vmem:[#allocation9] sm:$0x3] %v1870_v12 }
 0x2c2   :  { %1894 = dma.vmem_to_hbm [thread:$0]  %s1890_s1, 32, %s1892_s4, [#allocation10]  }
 0x2c3   :  { %2705 = dma.done.wait [#allocation4], 160  }
 0x2c4   :  { %2706 = vsyncadd [#allocation4], 4294967136 }
 0x2c5   :  { %2707 = dma.done.wait [#allocation10], 32  }
 0x2c6   :  { %2708 = vsyncadd [#allocation10], 4294967264 }
 0x2c7   :  { %1903 = vsyncpa [#allocation3], 1 }
 0x2c8   :  { %1904 = vsyncpa [#allocation6], 1 }
 0x2c9   :  { %1905 = vsyncpa [#allocation4], 1 }
 0x2ca   :  { %1906 = vsyncpa [#allocation10], 1 }

</bundles_post_ra>
